<compile_context>
chip_gen: v6e
topology: v6e:2x2x1
jax: 0.10.0
libtpu: 0.0.40
codegen_flags: <defaults>
</compile_context>

<pallas_src>
import functools

import jax
import jax.numpy as jnp
from jax.experimental import pallas as pl
from jax.experimental.pallas import tpu as pltpu

LN_EPS = 1e-3      # LaMP LayerNormalization eps (added to the *unbiased* std)
MASK_NEG = -1e30   # additive mask value (exp underflows to exactly 0)


# ----------------------------- kernel math -----------------------------------
def _layer_norm(z, a, b):
    """LaMP LayerNormalization: unbiased variance (D-1), eps added to the std."""
    mu = jnp.mean(z, axis=-1, keepdims=True)
    d = z - mu
    var = jnp.sum(d * d, axis=-1, keepdims=True) * (1.0 / (z.shape[-1] - 1))
    return d / (jnp.sqrt(var) + LN_EPS) * a + b


def _mha(xq, xkv, B, Lq, Lk, mask_add, wq, wk, wv, pw, pb, la, lb,
         n_head, d_k, d_v, d_model):
    """Multi-head attention on flattened (B*Lq, D) / (B*Lk, D) activations.

    wq/wk/wv are head-fused (D, H*dk) matrices (wq pre-scaled by 1/sqrt(D));
    pw is the (H*dv, D) output projection, accumulated per head (no concat).
    """
    q = jnp.dot(xq, wq, preferred_element_type=jnp.float32).reshape(B, Lq, n_head * d_k)
    k = jnp.dot(xkv, wk, preferred_element_type=jnp.float32).reshape(B, Lk, n_head * d_k)
    v = jnp.dot(xkv, wv, preferred_element_type=jnp.float32).reshape(B, Lk, n_head * d_v)

    acc = jnp.zeros((B * Lq, d_model), jnp.float32)
    for h in range(n_head):                               # static unroll (small)
        qh = q[:, :, h * d_k:(h + 1) * d_k]               # (B, Lq, dk)
        kh = k[:, :, h * d_k:(h + 1) * d_k]               # (B, Lk, dk)
        vh = v[:, :, h * d_v:(h + 1) * d_v]               # (B, Lk, dv)
        s = jnp.einsum('bqd,bkd->bqk', qh, kh,
                       preferred_element_type=jnp.float32)   # (B, Lq, Lk)
        if mask_add is not None:
            s = s + mask_add                              # additive 0 / -1e30
        m = jnp.max(s, axis=-1, keepdims=True)
        e = jnp.exp(s - m)
        p = e * pl.reciprocal(jnp.sum(e, axis=-1, keepdims=True), approx=True)
        ho = jnp.einsum('bqk,bkd->bqd', p, vh,
                        preferred_element_type=jnp.float32)  # (B, Lq, dv)
        acc = acc + jnp.dot(ho.reshape(B * Lq, d_v),
                            pw[h * d_v:(h + 1) * d_v, :],
                            preferred_element_type=jnp.float32)
    out = acc + pb
    return _layer_norm(out + xq, la, lb)


def fused_decoder_kernel(emb_ref, enc_ref, mask_ref, win_ref, wout_ref, vec_ref,
                         out_ref, x_scr, *,
                         B, L, S, D, DH, n_head, n_head2, d_k, d_v):
    layer = pl.program_id(0)

    # Layer 0: embedding of tgt_seq = arange(L) is just the table, broadcast
    # over the batch into the VMEM-resident activation scratch.
    @pl.when(layer == 0)
    def _():
        for b in range(B):                    # static python loop, B is tiny
            x_scr[b] = emb_ref[...]

    # ---- unpack this layer's packed parameter blobs (static slices) ----
    win = win_ref[0]                          # (D, 256)  input-side weights
    wout = wout_ref[0]                        # (128, D)  output-side weights
    vec = vec_ref[0]                          # (10, max(D, DH)) biases + LN

    o = 0
    s_wq = win[:, o:o + n_head2 * d_k]; o += n_head2 * d_k
    s_wk = win[:, o:o + n_head2 * d_k]; o += n_head2 * d_k
    s_wv = win[:, o:o + n_head2 * d_v]; o += n_head2 * d_v
    e_wq = win[:, o:o + n_head * d_k];  o += n_head * d_k
    e_wk = win[:, o:o + n_head * d_k];  o += n_head * d_k
    e_wv = win[:, o:o + n_head * d_v];  o += n_head * d_v
    f_w1 = win[:, o:o + DH]

    r = 0
    s_pw = wout[r:r + n_head2 * d_v, :]; r += n_head2 * d_v
    e_pw = wout[r:r + n_head * d_v, :];  r += n_head * d_v
    f_w2 = wout[r:r + DH, :]

    s_pb, s_la, s_lb = vec[0:1, :D], vec[1:2, :D], vec[2:3, :D]
    e_pb, e_la, e_lb = vec[3:4, :D], vec[4:5, :D], vec[5:6, :D]
    f_b2, f_la, f_lb = vec[6:7, :D], vec[7:8, :D], vec[8:9, :D]
    f_b1 = vec[9:10, :DH]

    mask_add = mask_ref[...]                  # (L, L) additive label mask

    xf = x_scr[...].reshape(B * L, D)         # flattened activations
    encf = enc_ref[...].reshape(B * S, D)     # flattened encoder output

    # 1) label self-attention (n_head2 heads, 'inveye' mask)
    y = _mha(xf, xf, B, L, L, mask_add,
             s_wq, s_wk, s_wv, s_pw, s_pb, s_la, s_lb,
             n_head2, d_k, d_v, D)
    # 2) encoder-decoder attention (n_head heads, no mask since enc_vec=True)
    y = _mha(y, encf, B, L, S, None,
             e_wq, e_wk, e_wv, e_pw, e_pb, e_la, e_lb,
             n_head, d_k, d_v, D)
    # 3) position-wise FFN (Conv1d kernel=1 == matmul), residual + LN
    h1 = jnp.maximum(jnp.dot(y, f_w1, preferred_element_type=jnp.float32) + f_b1, 0.0)
    z = jnp.dot(h1, f_w2, preferred_element_type=jnp.float32) + f_b2
    x_new = _layer_norm(z + y, f_la, f_lb).reshape(B, L, D)

    x_scr[...] = x_new                        # carry activation to next layer

    @pl.when(layer == pl.num_programs(0) - 1)
    def _():
        out_ref[...] = x_new


# ------------------------------- wrapper --------------------------------------
def graph_decoder_forward(src_seq, enc_output, emb_table, packed, mask_add,
                          *, n_head, n_head2, d_k, d_v, d_inner):
    """GraphDecoder.forward (return_attns=False, int_preds=False, enc_vec=True)."""
    del src_seq  # only used by the (untranslated) enc_vec=False padding-mask branch
    p_win, p_wout, p_vec = packed
    n_layers = p_win.shape[0]
    B, S, D = enc_output.shape
    L = emb_table.shape[0]

    kernel = functools.partial(fused_decoder_kernel,
                               B=B, L=L, S=S, D=D, DH=d_inner,
                               n_head=n_head, n_head2=n_head2, d_k=d_k, d_v=d_v)
    out = pl.pallas_call(
        kernel,
        out_shape=jax.ShapeDtypeStruct((B, L, D), jnp.float32),
        grid=(n_layers,),
        in_specs=[
            pl.BlockSpec((L, D), lambda l: (0, 0)),          # embedding table
            pl.BlockSpec((B, S, D), lambda l: (0, 0, 0)),    # encoder output
            pl.BlockSpec((L, L), lambda l: (0, 0)),          # additive label mask
            pl.BlockSpec((1,) + p_win.shape[1:], lambda l: (l, 0, 0)),
            pl.BlockSpec((1,) + p_wout.shape[1:], lambda l: (l, 0, 0)),
            pl.BlockSpec((1,) + p_vec.shape[1:], lambda l: (l, 0, 0)),
        ],
        out_specs=pl.BlockSpec((B, L, D), lambda l: (0, 0, 0)),
        scratch_shapes=[pltpu.VMEM((B, L, D), jnp.float32)],   # resident activation
        compiler_params=pltpu.CompilerParams(
            # Sequential layer axis (activation carried in VMEM scratch).
            # Deliberately nothing marked "parallel": work per step is sub-µs,
            # so sharding across v7x's two TensorCores would be pure overhead.
            dimension_semantics=("arbitrary",)),
    )(emb_table, enc_output, mask_add, p_win, p_wout, p_vec)
    return out, None


# ------------------------- host-side parameter packing ------------------------
def pack_layer_params(layer_params, *, d_model, d_inner):
    """Fuse the 20 per-layer LaMP params into 3 stacked blobs (leading dim = n_layers)."""
    temper = float(d_model) ** 0.5

    def fuse_heads(w):            # (H, D, dh) -> (D, H*dh); column block h == head h
        return jnp.transpose(w, (1, 0, 2)).reshape(d_model, -1)

    vw = max(d_model, d_inner)

    def padv(v):                  # (1, n) -> (1, vw)
        return jnp.pad(v, ((0, 0), (0, vw - v.shape[1])))

    wins, wouts, vecs = [], [], []
    for p in layer_params:
        wins.append(jnp.concatenate([
            fuse_heads(p["s_wq"]) / temper,       # temperature folded into W_q
            fuse_heads(p["s_wk"]),
            fuse_heads(p["s_wv"]),
            fuse_heads(p["e_wq"]) / temper,
            fuse_heads(p["e_wk"]),
            fuse_heads(p["e_wv"]),
            p["f_w1"],
        ], axis=1))                                # (D, 256)
        wouts.append(jnp.concatenate([p["s_pw"], p["e_pw"], p["f_w2"]], axis=0))  # (128, D)
        vecs.append(jnp.concatenate([
            padv(p["s_pb"]), padv(p["s_la"]), padv(p["s_lb"]),
            padv(p["e_pb"]), padv(p["e_la"]), padv(p["e_lb"]),
            padv(p["f_b2"]), padv(p["f_la"]), padv(p["f_lb"]),
            padv(p["f_b1"]),
        ], axis=0))                                # (10, max(D, DH))
    return jnp.stack(wins), jnp.stack(wouts), jnp.stack(vecs)


# --------------------------- deterministic init --------------------------------
def init_layer_params(key, d_model, d_inner, n_head, n_head2, d_k, d_v):
    ks = jax.random.split(key, 10)

    def nrm(k, shape, scale=0.1):
        return jax.random.normal(k, shape, jnp.float32) * scale

    return dict(
        s_wq=nrm(ks[0], (n_head2, d_model, d_k)),
        s_wk=nrm(ks[1], (n_head2, d_model, d_k)),
        s_wv=nrm(ks[2], (n_head2, d_model, d_v)),
        s_pw=nrm(ks[3], (n_head2 * d_v, d_model)),   # Linear weight, pre-transposed
        s_pb=jnp.zeros((1, d_model), jnp.float32),
        s_la=jnp.ones((1, d_model), jnp.float32),
        s_lb=jnp.zeros((1, d_model), jnp.float32),
        e_wq=nrm(ks[4], (n_head, d_model, d_k)),
        e_wk=nrm(ks[5], (n_head, d_model, d_k)),
        e_wv=nrm(ks[6], (n_head, d_model, d_v)),
        e_pw=nrm(ks[7], (n_head * d_v, d_model)),
        e_pb=jnp.zeros((1, d_model), jnp.float32),
        e_la=jnp.ones((1, d_model), jnp.float32),
        e_lb=jnp.zeros((1, d_model), jnp.float32),
        f_w1=nrm(ks[8], (d_model, d_inner)),         # Conv1d(k=1) weight, pre-transposed
        f_b1=jnp.zeros((1, d_inner), jnp.float32),
        f_w2=nrm(ks[9], (d_inner, d_model)),
        f_b2=jnp.zeros((1, d_model), jnp.float32),
        f_la=jnp.ones((1, d_model), jnp.float32),
        f_lb=jnp.zeros((1, d_model), jnp.float32),
    )


# ----------------------------- pure-JAX reference ------------------------------
def _ref_layer_norm(z, a, b):
    mu = jnp.mean(z, axis=-1, keepdims=True)
    var = jnp.sum((z - mu) ** 2, axis=-1, keepdims=True) / (z.shape[-1] - 1)
    return (z - mu) / (jnp.sqrt(var) + LN_EPS) * a + b


def _ref_mha(xq, xkv, mask, wq, wk, wv, pw, pb, la, lb, n_head, temper):
    heads = []
    for h in range(n_head):
        q = xq @ wq[h]
        k = xkv @ wk[h]
        v = xkv @ wv[h]
        s = jnp.einsum('bqd,bkd->bqk', q, k) / temper
        if mask is not None:
            s = jnp.where(mask > 0.5, -jnp.inf, s)
        p = jax.nn.softmax(s, axis=-1)
        heads.append(jnp.einsum('bqk,bkd->bqd', p, v))
    out = jnp.concatenate(heads, axis=-1) @ pw + pb
    return _ref_layer_norm(out + xq, la, lb)


def reference_forward(enc_output, emb_table, layer_params, label_mask,
                      *, n_head, n_head2):
    B = enc_output.shape[0]
    L, D = emb_table.shape
    temper = float(D) ** 0.5
    x = jnp.broadcast_to(emb_table[None], (B, L, D)).astype(jnp.float32)
    for p in layer_params:
        x = _ref_mha(x, x, label_mask, p["s_wq"], p["s_wk"], p["s_wv"],
                     p["s_pw"], p["s_pb"], p["s_la"], p["s_lb"], n_head2, temper)
        x = _ref_mha(x, enc_output, None, p["e_wq"], p["e_wk"], p["e_wv"],
                     p["e_pw"], p["e_pb"], p["e_la"], p["e_lb"], n_head, temper)
        h = jnp.maximum(x @ p["f_w1"] + p["f_b1"], 0.0)
        z = h @ p["f_w2"] + p["f_b2"]
        x = _ref_layer_norm(z + x, p["f_la"], p["f_lb"])
    return x


# ---------------------------------- main ---------------------------------------
if __name__ == "__main__":
    # small config consistent with the module
    n_tgt_vocab = 8       # L (number of labels)
    d_model = 32          # = d_word_vec
    d_inner_hid = 64
    n_head = 4
    n_head2 = 4
    d_k = d_v = 8
    n_layers = 2
    batch = 2
    src_len = 8           # encoder sequence length

    key = jax.random.PRNGKey(0)
    k_emb, k_enc, k_src, k_layers = jax.random.split(key, 4)

    emb_table = jax.random.normal(k_emb, (n_tgt_vocab, d_model), jnp.float32) * 0.1
    enc_output = jax.random.normal(k_enc, (batch, src_len, d_model), jnp.float32) * 0.1
    src_seq = jax.random.randint(k_src, (batch, src_len), 1, 100, jnp.int32)

    # label_mask = 'inveye' : 1 - eye(L)  (1 == masked); kernel uses additive form.
    label_mask = 1.0 - jnp.eye(n_tgt_vocab, dtype=jnp.float32)
    mask_add = label_mask * MASK_NEG

    layer_keys = jax.random.split(k_layers, n_layers)
    layer_params = [init_layer_params(lk, d_model, d_inner_hid, n_head, n_head2,
                                      d_k, d_v) for lk in layer_keys]
    packed = pack_layer_params(layer_params, d_model=d_model, d_inner=d_inner_hid)

    # TODO(synk): dropout layers are identity (eval mode); the enc_vec=False
    # padding-mask branch and return_attns/int_preds outputs are not implemented.

    dec_output, _ = graph_decoder_forward(src_seq, enc_output, emb_table, packed,
                                          mask_add, n_head=n_head, n_head2=n_head2,
                                          d_k=d_k, d_v=d_v, d_inner=d_inner_hid)
    dec_output = jax.block_until_ready(dec_output)

    ref = reference_forward(enc_output, emb_table, layer_params, label_mask,
                            n_head=n_head, n_head2=n_head2)
    assert dec_output.shape == (batch, n_tgt_vocab, d_model)
    # Tolerance covers the EUP approximate reciprocal used for the softmax
    # normalization inside the kernel (everything else is exact fp32).
    assert jnp.allclose(dec_output, ref, atol=5e-3, rtol=5e-3)

    print("KERNEL_OK")
</pallas_src>

<mosaic_0001>
module attributes {stable_mosaic.version = 11 : i64} {
  func.func @fused_decoder_kernel(%arg0: i32, %arg1: memref<8x32xf32, #tpu.memory_space<vmem>>, %arg2: memref<2x8x32xf32, #tpu.memory_space<vmem>>, %arg3: memref<8x8xf32, #tpu.memory_space<vmem>>, %arg4: memref<1x32x256xf32, #tpu.memory_space<vmem>>, %arg5: memref<1x128x32xf32, #tpu.memory_space<vmem>>, %arg6: memref<1x10x64xf32, #tpu.memory_space<vmem>>, %arg7: memref<2x8x32xf32, #tpu.memory_space<vmem>>, %arg8: memref<2x8x32xf32, #tpu.memory_space<vmem>>) attributes {dimension_semantics = [#tpu.dimension_semantics<arbitrary>], iteration_bounds = array<i64: 2>, scalar_prefetch = 0 : i64, scratch_operands = 1 : i64, tpu.core_type = #tpu.core_type<tc>, window_params = [{pipeline_mode = #tpu.pipeline_mode<synchronous>, transform_indices = @transform_0, window_bounds = array<i64: 8, 32>}, {pipeline_mode = #tpu.pipeline_mode<synchronous>, transform_indices = @transform_1, window_bounds = array<i64: 2, 8, 32>}, {pipeline_mode = #tpu.pipeline_mode<synchronous>, transform_indices = @transform_2, window_bounds = array<i64: 8, 8>}, {transform_indices = @transform_3, window_bounds = array<i64: 1, 32, 256>}, {transform_indices = @transform_4, window_bounds = array<i64: 1, 128, 32>}, {transform_indices = @transform_5, window_bounds = array<i64: 1, 10, 64>}, {pipeline_mode = #tpu.pipeline_mode<synchronous>, transform_indices = @transform_6, window_bounds = array<i64: 2, 8, 32>}]} {
    %c0_i32 = arith.constant 0 : i32
    %0 = arith.cmpi eq, %arg0, %c0_i32 : i32
    %1 = arith.extui %0 : i1 to i32
    %c0_i32_0 = arith.constant 0 : i32
    %2 = arith.cmpi ne, %1, %c0_i32_0 : i32
    scf.if %2 {
      %c0_86 = arith.constant 0 : index
      %c0_87 = arith.constant 0 : index
      %292 = vector.load %arg1[%c0_86, %c0_87] : memref<8x32xf32, #tpu.memory_space<vmem>>, vector<8x32xf32>
      %c0_88 = arith.constant 0 : index
      %c0_89 = arith.constant 0 : index
      %c0_90 = arith.constant 0 : index
      %293 = vector.load %arg8[%c0_88, %c0_89, %c0_90] : memref<2x8x32xf32, #tpu.memory_space<vmem>>, vector<1x8x32xf32>
      %294 = vector.shape_cast %293 : vector<1x8x32xf32> to vector<8x32xf32>
      %295 = vector.shape_cast %292 : vector<8x32xf32> to vector<1x8x32xf32>
      tpu.vector_store %arg8[%c0_88, %c0_89, %c0_90], %295 {strides = array<i32>} : memref<2x8x32xf32, #tpu.memory_space<vmem>>, vector<1x8x32xf32>,
      %c0_91 = arith.constant 0 : index
      %c0_92 = arith.constant 0 : index
      %296 = vector.load %arg1[%c0_91, %c0_92] : memref<8x32xf32, #tpu.memory_space<vmem>>, vector<8x32xf32>
      %c1 = arith.constant 1 : index
      %c0_93 = arith.constant 0 : index
      %c0_94 = arith.constant 0 : index
      %297 = vector.load %arg8[%c1, %c0_93, %c0_94] : memref<2x8x32xf32, #tpu.memory_space<vmem>>, vector<1x8x32xf32>
      %298 = vector.shape_cast %297 : vector<1x8x32xf32> to vector<8x32xf32>
      %299 = vector.shape_cast %296 : vector<8x32xf32> to vector<1x8x32xf32>
      tpu.vector_store %arg8[%c1, %c0_93, %c0_94], %299 {strides = array<i32>} : memref<2x8x32xf32, #tpu.memory_space<vmem>>, vector<1x8x32xf32>,
    } else {
    }
    %c0 = arith.constant 0 : index
    %c0_1 = arith.constant 0 : index
    %c0_2 = arith.constant 0 : index
    %3 = vector.load %arg4[%c0, %c0_1, %c0_2] : memref<1x32x256xf32, #tpu.memory_space<vmem>>, vector<1x32x256xf32>
    %4 = vector.shape_cast %3 : vector<1x32x256xf32> to vector<32x256xf32>
    %c0_3 = arith.constant 0 : index
    %c0_4 = arith.constant 0 : index
    %c0_5 = arith.constant 0 : index
    %5 = vector.load %arg5[%c0_3, %c0_4, %c0_5] : memref<1x128x32xf32, #tpu.memory_space<vmem>>, vector<1x128x32xf32>
    %6 = vector.shape_cast %5 : vector<1x128x32xf32> to vector<128x32xf32>
    %c0_6 = arith.constant 0 : index
    %c0_7 = arith.constant 0 : index
    %c0_8 = arith.constant 0 : index
    %7 = vector.load %arg6[%c0_6, %c0_7, %c0_8] : memref<1x10x64xf32, #tpu.memory_space<vmem>>, vector<1x10x64xf32>
    %8 = vector.shape_cast %7 : vector<1x10x64xf32> to vector<10x64xf32>
    %9 = vector.extract_strided_slice %4 {offsets = [0, 0], sizes = [32, 32], strides = [1, 1]} : vector<32x256xf32> to vector<32x32xf32>
    %10 = vector.extract_strided_slice %4 {offsets = [0, 32], sizes = [32, 32], strides = [1, 1]} : vector<32x256xf32> to vector<32x32xf32>
    %11 = vector.extract_strided_slice %4 {offsets = [0, 64], sizes = [32, 32], strides = [1, 1]} : vector<32x256xf32> to vector<32x32xf32>
    %12 = vector.extract_strided_slice %4 {offsets = [0, 96], sizes = [32, 32], strides = [1, 1]} : vector<32x256xf32> to vector<32x32xf32>
    %13 = vector.extract_strided_slice %4 {offsets = [0, 128], sizes = [32, 32], strides = [1, 1]} : vector<32x256xf32> to vector<32x32xf32>
    %14 = vector.extract_strided_slice %4 {offsets = [0, 160], sizes = [32, 32], strides = [1, 1]} : vector<32x256xf32> to vector<32x32xf32>
    %15 = vector.extract_strided_slice %4 {offsets = [0, 192], sizes = [32, 64], strides = [1, 1]} : vector<32x256xf32> to vector<32x64xf32>
    %16 = vector.extract_strided_slice %6 {offsets = [0, 0], sizes = [32, 32], strides = [1, 1]} : vector<128x32xf32> to vector<32x32xf32>
    %17 = vector.extract_strided_slice %6 {offsets = [32, 0], sizes = [32, 32], strides = [1, 1]} : vector<128x32xf32> to vector<32x32xf32>
    %18 = vector.extract_strided_slice %6 {offsets = [64, 0], sizes = [64, 32], strides = [1, 1]} : vector<128x32xf32> to vector<64x32xf32>
    %19 = vector.extract_strided_slice %8 {offsets = [0, 0], sizes = [1, 32], strides = [1, 1]} : vector<10x64xf32> to vector<1x32xf32>
    %20 = vector.extract_strided_slice %8 {offsets = [1, 0], sizes = [1, 32], strides = [1, 1]} : vector<10x64xf32> to vector<1x32xf32>
    %21 = vector.extract_strided_slice %8 {offsets = [2, 0], sizes = [1, 32], strides = [1, 1]} : vector<10x64xf32> to vector<1x32xf32>
    %22 = vector.extract_strided_slice %8 {offsets = [3, 0], sizes = [1, 32], strides = [1, 1]} : vector<10x64xf32> to vector<1x32xf32>
    %23 = vector.extract_strided_slice %8 {offsets = [4, 0], sizes = [1, 32], strides = [1, 1]} : vector<10x64xf32> to vector<1x32xf32>
    %24 = vector.extract_strided_slice %8 {offsets = [5, 0], sizes = [1, 32], strides = [1, 1]} : vector<10x64xf32> to vector<1x32xf32>
    %25 = vector.extract_strided_slice %8 {offsets = [6, 0], sizes = [1, 32], strides = [1, 1]} : vector<10x64xf32> to vector<1x32xf32>
    %26 = vector.extract_strided_slice %8 {offsets = [7, 0], sizes = [1, 32], strides = [1, 1]} : vector<10x64xf32> to vector<1x32xf32>
    %27 = vector.extract_strided_slice %8 {offsets = [8, 0], sizes = [1, 32], strides = [1, 1]} : vector<10x64xf32> to vector<1x32xf32>
    %28 = vector.extract_strided_slice %8 {offsets = [9, 0], sizes = [1, 64], strides = [1, 1]} : vector<10x64xf32> to vector<1x64xf32>
    %c0_9 = arith.constant 0 : index
    %c0_10 = arith.constant 0 : index
    %29 = vector.load %arg3[%c0_9, %c0_10] : memref<8x8xf32, #tpu.memory_space<vmem>>, vector<8x8xf32>
    %c0_11 = arith.constant 0 : index
    %c0_12 = arith.constant 0 : index
    %c0_13 = arith.constant 0 : index
    %30 = vector.load %arg8[%c0_11, %c0_12, %c0_13] : memref<2x8x32xf32, #tpu.memory_space<vmem>>, vector<2x8x32xf32>
    %31 = vector.shape_cast %30 : vector<2x8x32xf32> to vector<16x32xf32>
    %c0_14 = arith.constant 0 : index
    %c0_15 = arith.constant 0 : index
    %c0_16 = arith.constant 0 : index
    %32 = vector.load %arg2[%c0_14, %c0_15, %c0_16] : memref<2x8x32xf32, #tpu.memory_space<vmem>>, vector<2x8x32xf32>
    %33 = vector.shape_cast %32 : vector<2x8x32xf32> to vector<16x32xf32>
    %cst = arith.constant dense<0.000000e+00> : vector<16x32xf32>
    %34 = tpu.matmul %31, %9, %cst {dimension_numbers = #tpu.dot_dimension_numbers<[1], [0], [0], [1], [0, 0, 1, 1], [], []>} : vector<16x32xf32>, vector<32x32xf32>, vector<16x32xf32> -> vector<16x32xf32>
    %35 = vector.shape_cast %34 : vector<16x32xf32> to vector<2x8x32xf32>
    %cst_17 = arith.constant dense<0.000000e+00> : vector<16x32xf32>
    %36 = tpu.matmul %31, %10, %cst_17 {dimension_numbers = #tpu.dot_dimension_numbers<[1], [0], [0], [1], [0, 0, 1, 1], [], []>} : vector<16x32xf32>, vector<32x32xf32>, vector<16x32xf32> -> vector<16x32xf32>
    %37 = vector.shape_cast %36 : vector<16x32xf32> to vector<2x8x32xf32>
    %cst_18 = arith.constant dense<0.000000e+00> : vector<16x32xf32>
    %38 = tpu.matmul %31, %11, %cst_18 {dimension_numbers = #tpu.dot_dimension_numbers<[1], [0], [0], [1], [0, 0, 1, 1], [], []>} : vector<16x32xf32>, vector<32x32xf32>, vector<16x32xf32> -> vector<16x32xf32>
    %39 = vector.shape_cast %38 : vector<16x32xf32> to vector<2x8x32xf32>
    %cst_19 = arith.constant 0.000000e+00 : f32
    %40 = vector.broadcast %cst_19 : f32 to vector<16x32xf32>
    %41 = vector.extract_strided_slice %35 {offsets = [0, 0, 0], sizes = [2, 8, 8], strides = [1, 1, 1]} : vector<2x8x32xf32> to vector<2x8x8xf32>
    %42 = vector.extract_strided_slice %37 {offsets = [0, 0, 0], sizes = [2, 8, 8], strides = [1, 1, 1]} : vector<2x8x32xf32> to vector<2x8x8xf32>
    %43 = vector.extract_strided_slice %39 {offsets = [0, 0, 0], sizes = [2, 8, 8], strides = [1, 1, 1]} : vector<2x8x32xf32> to vector<2x8x8xf32>
    "tpu.trace_start"() <{level = 10 : i32, message = "bqd,bkd->bqk"}> : () -> ()
    %cst_20 = arith.constant dense<0.000000e+00> : vector<2x8x8xf32>
    %44 = tpu.matmul %41, %42, %cst_20 {dimension_numbers = #tpu.dot_dimension_numbers<[2], [2], [1], [1], [0, 0, 0, 1, 1, 1], [0], [0]>} : vector<2x8x8xf32>, vector<2x8x8xf32>, vector<2x8x8xf32> -> vector<2x8x8xf32>
    "tpu.trace_stop"() : () -> ()
    %45 = vector.shape_cast %29 : vector<8x8xf32> to vector<1x8x8xf32>
    %46 = vector.broadcast %45 : vector<1x8x8xf32> to vector<2x8x8xf32>
    %47 = arith.addf %44, %46 : vector<2x8x8xf32>
    %cst_21 = arith.constant dense<0xFF800000> : vector<2x8xf32>
    %48 = vector.multi_reduction <maximumf>, %47, %cst_21 [2] : vector<2x8x8xf32> to vector<2x8xf32>
    %49 = vector.shape_cast %48 : vector<2x8xf32> to vector<2x8x1xf32>
    %50 = vector.broadcast %49 : vector<2x8x1xf32> to vector<2x8x8xf32>
    %51 = arith.subf %47, %50 : vector<2x8x8xf32>
    %52 = math.exp %51 : vector<2x8x8xf32>
    %cst_22 = arith.constant dense<0.000000e+00> : vector<2x8xf32>
    %53 = vector.multi_reduction <add>, %52, %cst_22 [2] : vector<2x8x8xf32> to vector<2x8xf32>
    %54 = vector.shape_cast %53 : vector<2x8xf32> to vector<2x8x1xf32>
    %55 = tpu.reciprocal %54 {approx = true} : vector<2x8x1xf32> -> vector<2x8x1xf32>
    %56 = vector.broadcast %55 : vector<2x8x1xf32> to vector<2x8x8xf32>
    %57 = arith.mulf %52, %56 : vector<2x8x8xf32>
    "tpu.trace_start"() <{level = 10 : i32, message = "bqk,bkd->bqd"}> : () -> ()
    %cst_23 = arith.constant dense<0.000000e+00> : vector<2x8x8xf32>
    %58 = tpu.matmul %57, %43, %cst_23 {dimension_numbers = #tpu.dot_dimension_numbers<[2], [1], [1], [2], [0, 0, 0, 1, 1, 2], [0], [0]>} : vector<2x8x8xf32>, vector<2x8x8xf32>, vector<2x8x8xf32> -> vector<2x8x8xf32>
    "tpu.trace_stop"() : () -> ()
    %59 = vector.shape_cast %58 : vector<2x8x8xf32> to vector<16x8xf32>
    %60 = vector.extract_strided_slice %16 {offsets = [0, 0], sizes = [8, 32], strides = [1, 1]} : vector<32x32xf32> to vector<8x32xf32>
    %cst_24 = arith.constant dense<0.000000e+00> : vector<16x32xf32>
    %61 = tpu.matmul %59, %60, %cst_24 {dimension_numbers = #tpu.dot_dimension_numbers<[1], [0], [0], [1], [0, 0, 1, 1], [], []>} : vector<16x8xf32>, vector<8x32xf32>, vector<16x32xf32> -> vector<16x32xf32>
    %62 = arith.addf %40, %61 : vector<16x32xf32>
    %63 = vector.extract_strided_slice %35 {offsets = [0, 0, 8], sizes = [2, 8, 8], strides = [1, 1, 1]} : vector<2x8x32xf32> to vector<2x8x8xf32>
    %64 = vector.extract_strided_slice %37 {offsets = [0, 0, 8], sizes = [2, 8, 8], strides = [1, 1, 1]} : vector<2x8x32xf32> to vector<2x8x8xf32>
    %65 = vector.extract_strided_slice %39 {offsets = [0, 0, 8], sizes = [2, 8, 8], strides = [1, 1, 1]} : vector<2x8x32xf32> to vector<2x8x8xf32>
    "tpu.trace_start"() <{level = 10 : i32, message = "bqd,bkd->bqk"}> : () -> ()
    %cst_25 = arith.constant dense<0.000000e+00> : vector<2x8x8xf32>
    %66 = tpu.matmul %63, %64, %cst_25 {dimension_numbers = #tpu.dot_dimension_numbers<[2], [2], [1], [1], [0, 0, 0, 1, 1, 1], [0], [0]>} : vector<2x8x8xf32>, vector<2x8x8xf32>, vector<2x8x8xf32> -> vector<2x8x8xf32>
    "tpu.trace_stop"() : () -> ()
    %67 = vector.shape_cast %29 : vector<8x8xf32> to vector<1x8x8xf32>
    %68 = vector.broadcast %67 : vector<1x8x8xf32> to vector<2x8x8xf32>
    %69 = arith.addf %66, %68 : vector<2x8x8xf32>
    %cst_26 = arith.constant dense<0xFF800000> : vector<2x8xf32>
    %70 = vector.multi_reduction <maximumf>, %69, %cst_26 [2] : vector<2x8x8xf32> to vector<2x8xf32>
    %71 = vector.shape_cast %70 : vector<2x8xf32> to vector<2x8x1xf32>
    %72 = vector.broadcast %71 : vector<2x8x1xf32> to vector<2x8x8xf32>
    %73 = arith.subf %69, %72 : vector<2x8x8xf32>
    %74 = math.exp %73 : vector<2x8x8xf32>
    %cst_27 = arith.constant dense<0.000000e+00> : vector<2x8xf32>
    %75 = vector.multi_reduction <add>, %74, %cst_27 [2] : vector<2x8x8xf32> to vector<2x8xf32>
    %76 = vector.shape_cast %75 : vector<2x8xf32> to vector<2x8x1xf32>
    %77 = tpu.reciprocal %76 {approx = true} : vector<2x8x1xf32> -> vector<2x8x1xf32>
    %78 = vector.broadcast %77 : vector<2x8x1xf32> to vector<2x8x8xf32>
    %79 = arith.mulf %74, %78 : vector<2x8x8xf32>
    "tpu.trace_start"() <{level = 10 : i32, message = "bqk,bkd->bqd"}> : () -> ()
    %cst_28 = arith.constant dense<0.000000e+00> : vector<2x8x8xf32>
    %80 = tpu.matmul %79, %65, %cst_28 {dimension_numbers = #tpu.dot_dimension_numbers<[2], [1], [1], [2], [0, 0, 0, 1, 1, 2], [0], [0]>} : vector<2x8x8xf32>, vector<2x8x8xf32>, vector<2x8x8xf32> -> vector<2x8x8xf32>
    "tpu.trace_stop"() : () -> ()
    %81 = vector.shape_cast %80 : vector<2x8x8xf32> to vector<16x8xf32>
    %82 = vector.extract_strided_slice %16 {offsets = [8, 0], sizes = [8, 32], strides = [1, 1]} : vector<32x32xf32> to vector<8x32xf32>
    %cst_29 = arith.constant dense<0.000000e+00> : vector<16x32xf32>
    %83 = tpu.matmul %81, %82, %cst_29 {dimension_numbers = #tpu.dot_dimension_numbers<[1], [0], [0], [1], [0, 0, 1, 1], [], []>} : vector<16x8xf32>, vector<8x32xf32>, vector<16x32xf32> -> vector<16x32xf32>
    %84 = arith.addf %62, %83 : vector<16x32xf32>
    %85 = vector.extract_strided_slice %35 {offsets = [0, 0, 16], sizes = [2, 8, 8], strides = [1, 1, 1]} : vector<2x8x32xf32> to vector<2x8x8xf32>
    %86 = vector.extract_strided_slice %37 {offsets = [0, 0, 16], sizes = [2, 8, 8], strides = [1, 1, 1]} : vector<2x8x32xf32> to vector<2x8x8xf32>
    %87 = vector.extract_strided_slice %39 {offsets = [0, 0, 16], sizes = [2, 8, 8], strides = [1, 1, 1]} : vector<2x8x32xf32> to vector<2x8x8xf32>
    "tpu.trace_start"() <{level = 10 : i32, message = "bqd,bkd->bqk"}> : () -> ()
    %cst_30 = arith.constant dense<0.000000e+00> : vector<2x8x8xf32>
    %88 = tpu.matmul %85, %86, %cst_30 {dimension_numbers = #tpu.dot_dimension_numbers<[2], [2], [1], [1], [0, 0, 0, 1, 1, 1], [0], [0]>} : vector<2x8x8xf32>, vector<2x8x8xf32>, vector<2x8x8xf32> -> vector<2x8x8xf32>
    "tpu.trace_stop"() : () -> ()
    %89 = vector.shape_cast %29 : vector<8x8xf32> to vector<1x8x8xf32>
    %90 = vector.broadcast %89 : vector<1x8x8xf32> to vector<2x8x8xf32>
    %91 = arith.addf %88, %90 : vector<2x8x8xf32>
    %cst_31 = arith.constant dense<0xFF800000> : vector<2x8xf32>
    %92 = vector.multi_reduction <maximumf>, %91, %cst_31 [2] : vector<2x8x8xf32> to vector<2x8xf32>
    %93 = vector.shape_cast %92 : vector<2x8xf32> to vector<2x8x1xf32>
    %94 = vector.broadcast %93 : vector<2x8x1xf32> to vector<2x8x8xf32>
    %95 = arith.subf %91, %94 : vector<2x8x8xf32>
    %96 = math.exp %95 : vector<2x8x8xf32>
    %cst_32 = arith.constant dense<0.000000e+00> : vector<2x8xf32>
    %97 = vector.multi_reduction <add>, %96, %cst_32 [2] : vector<2x8x8xf32> to vector<2x8xf32>
    %98 = vector.shape_cast %97 : vector<2x8xf32> to vector<2x8x1xf32>
    %99 = tpu.reciprocal %98 {approx = true} : vector<2x8x1xf32> -> vector<2x8x1xf32>
    %100 = vector.broadcast %99 : vector<2x8x1xf32> to vector<2x8x8xf32>
    %101 = arith.mulf %96, %100 : vector<2x8x8xf32>
    "tpu.trace_start"() <{level = 10 : i32, message = "bqk,bkd->bqd"}> : () -> ()
    %cst_33 = arith.constant dense<0.000000e+00> : vector<2x8x8xf32>
    %102 = tpu.matmul %101, %87, %cst_33 {dimension_numbers = #tpu.dot_dimension_numbers<[2], [1], [1], [2], [0, 0, 0, 1, 1, 2], [0], [0]>} : vector<2x8x8xf32>, vector<2x8x8xf32>, vector<2x8x8xf32> -> vector<2x8x8xf32>
    "tpu.trace_stop"() : () -> ()
    %103 = vector.shape_cast %102 : vector<2x8x8xf32> to vector<16x8xf32>
    %104 = vector.extract_strided_slice %16 {offsets = [16, 0], sizes = [8, 32], strides = [1, 1]} : vector<32x32xf32> to vector<8x32xf32>
    %cst_34 = arith.constant dense<0.000000e+00> : vector<16x32xf32>
    %105 = tpu.matmul %103, %104, %cst_34 {dimension_numbers = #tpu.dot_dimension_numbers<[1], [0], [0], [1], [0, 0, 1, 1], [], []>} : vector<16x8xf32>, vector<8x32xf32>, vector<16x32xf32> -> vector<16x32xf32>
    %106 = arith.addf %84, %105 : vector<16x32xf32>
    %107 = vector.extract_strided_slice %35 {offsets = [0, 0, 24], sizes = [2, 8, 8], strides = [1, 1, 1]} : vector<2x8x32xf32> to vector<2x8x8xf32>
    %108 = vector.extract_strided_slice %37 {offsets = [0, 0, 24], sizes = [2, 8, 8], strides = [1, 1, 1]} : vector<2x8x32xf32> to vector<2x8x8xf32>
    %109 = vector.extract_strided_slice %39 {offsets = [0, 0, 24], sizes = [2, 8, 8], strides = [1, 1, 1]} : vector<2x8x32xf32> to vector<2x8x8xf32>
    "tpu.trace_start"() <{level = 10 : i32, message = "bqd,bkd->bqk"}> : () -> ()
    %cst_35 = arith.constant dense<0.000000e+00> : vector<2x8x8xf32>
    %110 = tpu.matmul %107, %108, %cst_35 {dimension_numbers = #tpu.dot_dimension_numbers<[2], [2], [1], [1], [0, 0, 0, 1, 1, 1], [0], [0]>} : vector<2x8x8xf32>, vector<2x8x8xf32>, vector<2x8x8xf32> -> vector<2x8x8xf32>
    "tpu.trace_stop"() : () -> ()
    %111 = vector.shape_cast %29 : vector<8x8xf32> to vector<1x8x8xf32>
    %112 = vector.broadcast %111 : vector<1x8x8xf32> to vector<2x8x8xf32>
    %113 = arith.addf %110, %112 : vector<2x8x8xf32>
    %cst_36 = arith.constant dense<0xFF800000> : vector<2x8xf32>
    %114 = vector.multi_reduction <maximumf>, %113, %cst_36 [2] : vector<2x8x8xf32> to vector<2x8xf32>
    %115 = vector.shape_cast %114 : vector<2x8xf32> to vector<2x8x1xf32>
    %116 = vector.broadcast %115 : vector<2x8x1xf32> to vector<2x8x8xf32>
    %117 = arith.subf %113, %116 : vector<2x8x8xf32>
    %118 = math.exp %117 : vector<2x8x8xf32>
    %cst_37 = arith.constant dense<0.000000e+00> : vector<2x8xf32>
    %119 = vector.multi_reduction <add>, %118, %cst_37 [2] : vector<2x8x8xf32> to vector<2x8xf32>
    %120 = vector.shape_cast %119 : vector<2x8xf32> to vector<2x8x1xf32>
    %121 = tpu.reciprocal %120 {approx = true} : vector<2x8x1xf32> -> vector<2x8x1xf32>
    %122 = vector.broadcast %121 : vector<2x8x1xf32> to vector<2x8x8xf32>
    %123 = arith.mulf %118, %122 : vector<2x8x8xf32>
    "tpu.trace_start"() <{level = 10 : i32, message = "bqk,bkd->bqd"}> : () -> ()
    %cst_38 = arith.constant dense<0.000000e+00> : vector<2x8x8xf32>
    %124 = tpu.matmul %123, %109, %cst_38 {dimension_numbers = #tpu.dot_dimension_numbers<[2], [1], [1], [2], [0, 0, 0, 1, 1, 2], [0], [0]>} : vector<2x8x8xf32>, vector<2x8x8xf32>, vector<2x8x8xf32> -> vector<2x8x8xf32>
    "tpu.trace_stop"() : () -> ()
    %125 = vector.shape_cast %124 : vector<2x8x8xf32> to vector<16x8xf32>
    %126 = vector.extract_strided_slice %16 {offsets = [24, 0], sizes = [8, 32], strides = [1, 1]} : vector<32x32xf32> to vector<8x32xf32>
    %cst_39 = arith.constant dense<0.000000e+00> : vector<16x32xf32>
    %127 = tpu.matmul %125, %126, %cst_39 {dimension_numbers = #tpu.dot_dimension_numbers<[1], [0], [0], [1], [0, 0, 1, 1], [], []>} : vector<16x8xf32>, vector<8x32xf32>, vector<16x32xf32> -> vector<16x32xf32>
    %128 = arith.addf %106, %127 : vector<16x32xf32>
    %129 = vector.broadcast %19 : vector<1x32xf32> to vector<16x32xf32>
    %130 = arith.addf %128, %129 : vector<16x32xf32>
    %131 = arith.addf %130, %31 : vector<16x32xf32>
    %cst_40 = arith.constant dense<0.000000e+00> : vector<16xf32>
    %132 = vector.multi_reduction <add>, %131, %cst_40 [1] : vector<16x32xf32> to vector<16xf32>
    %133 = vector.shape_cast %132 : vector<16xf32> to vector<16x1xf32>
    %cst_41 = arith.constant 3.200000e+01 : f32
    %134 = vector.broadcast %cst_41 : f32 to vector<16x1xf32>
    %135 = arith.divf %133, %134 : vector<16x1xf32>
    %136 = vector.broadcast %135 : vector<16x1xf32> to vector<16x32xf32>
    %137 = arith.subf %131, %136 : vector<16x32xf32>
    %138 = arith.mulf %137, %137 : vector<16x32xf32>
    %cst_42 = arith.constant dense<0.000000e+00> : vector<16xf32>
    %139 = vector.multi_reduction <add>, %138, %cst_42 [1] : vector<16x32xf32> to vector<16xf32>
    %140 = vector.shape_cast %139 : vector<16xf32> to vector<16x1xf32>
    %cst_43 = arith.constant 0.0322580636 : f32
    %141 = vector.broadcast %cst_43 : f32 to vector<16x1xf32>
    %142 = arith.mulf %140, %141 : vector<16x1xf32>
    %143 = math.sqrt %142 : vector<16x1xf32>
    %cst_44 = arith.constant 1.000000e-03 : f32
    %144 = vector.broadcast %cst_44 : f32 to vector<16x1xf32>
    %145 = arith.addf %143, %144 : vector<16x1xf32>
    %146 = vector.broadcast %145 : vector<16x1xf32> to vector<16x32xf32>
    %147 = arith.divf %137, %146 : vector<16x32xf32>
    %148 = vector.broadcast %20 : vector<1x32xf32> to vector<16x32xf32>
    %149 = arith.mulf %147, %148 : vector<16x32xf32>
    %150 = vector.broadcast %21 : vector<1x32xf32> to vector<16x32xf32>
    %151 = arith.addf %149, %150 : vector<16x32xf32>
    %cst_45 = arith.constant dense<0.000000e+00> : vector<16x32xf32>
    %152 = tpu.matmul %151, %12, %cst_45 {dimension_numbers = #tpu.dot_dimension_numbers<[1], [0], [0], [1], [0, 0, 1, 1], [], []>} : vector<16x32xf32>, vector<32x32xf32>, vector<16x32xf32> -> vector<16x32xf32>
    %153 = vector.shape_cast %152 : vector<16x32xf32> to vector<2x8x32xf32>
    %cst_46 = arith.constant dense<0.000000e+00> : vector<16x32xf32>
    %154 = tpu.matmul %33, %13, %cst_46 {dimension_numbers = #tpu.dot_dimension_numbers<[1], [0], [0], [1], [0, 0, 1, 1], [], []>} : vector<16x32xf32>, vector<32x32xf32>, vector<16x32xf32> -> vector<16x32xf32>
    %155 = vector.shape_cast %154 : vector<16x32xf32> to vector<2x8x32xf32>
    %cst_47 = arith.constant dense<0.000000e+00> : vector<16x32xf32>
    %156 = tpu.matmul %33, %14, %cst_47 {dimension_numbers = #tpu.dot_dimension_numbers<[1], [0], [0], [1], [0, 0, 1, 1], [], []>} : vector<16x32xf32>, vector<32x32xf32>, vector<16x32xf32> -> vector<16x32xf32>
    %157 = vector.shape_cast %156 : vector<16x32xf32> to vector<2x8x32xf32>
    %cst_48 = arith.constant 0.000000e+00 : f32
    %158 = vector.broadcast %cst_48 : f32 to vector<16x32xf32>
    %159 = vector.extract_strided_slice %153 {offsets = [0, 0, 0], sizes = [2, 8, 8], strides = [1, 1, 1]} : vector<2x8x32xf32> to vector<2x8x8xf32>
    %160 = vector.extract_strided_slice %155 {offsets = [0, 0, 0], sizes = [2, 8, 8], strides = [1, 1, 1]} : vector<2x8x32xf32> to vector<2x8x8xf32>
    %161 = vector.extract_strided_slice %157 {offsets = [0, 0, 0], sizes = [2, 8, 8], strides = [1, 1, 1]} : vector<2x8x32xf32> to vector<2x8x8xf32>
    "tpu.trace_start"() <{level = 10 : i32, message = "bqd,bkd->bqk"}> : () -> ()
    %cst_49 = arith.constant dense<0.000000e+00> : vector<2x8x8xf32>
    %162 = tpu.matmul %159, %160, %cst_49 {dimension_numbers = #tpu.dot_dimension_numbers<[2], [2], [1], [1], [0, 0, 0, 1, 1, 1], [0], [0]>} : vector<2x8x8xf32>, vector<2x8x8xf32>, vector<2x8x8xf32> -> vector<2x8x8xf32>
    "tpu.trace_stop"() : () -> ()
    %cst_50 = arith.constant dense<0xFF800000> : vector<2x8xf32>
    %163 = vector.multi_reduction <maximumf>, %162, %cst_50 [2] : vector<2x8x8xf32> to vector<2x8xf32>
    %164 = vector.shape_cast %163 : vector<2x8xf32> to vector<2x8x1xf32>
    %165 = vector.broadcast %164 : vector<2x8x1xf32> to vector<2x8x8xf32>
    %166 = arith.subf %162, %165 : vector<2x8x8xf32>
    %167 = math.exp %166 : vector<2x8x8xf32>
    %cst_51 = arith.constant dense<0.000000e+00> : vector<2x8xf32>
    %168 = vector.multi_reduction <add>, %167, %cst_51 [2] : vector<2x8x8xf32> to vector<2x8xf32>
    %169 = vector.shape_cast %168 : vector<2x8xf32> to vector<2x8x1xf32>
    %170 = tpu.reciprocal %169 {approx = true} : vector<2x8x1xf32> -> vector<2x8x1xf32>
    %171 = vector.broadcast %170 : vector<2x8x1xf32> to vector<2x8x8xf32>
    %172 = arith.mulf %167, %171 : vector<2x8x8xf32>
    "tpu.trace_start"() <{level = 10 : i32, message = "bqk,bkd->bqd"}> : () -> ()
    %cst_52 = arith.constant dense<0.000000e+00> : vector<2x8x8xf32>
    %173 = tpu.matmul %172, %161, %cst_52 {dimension_numbers = #tpu.dot_dimension_numbers<[2], [1], [1], [2], [0, 0, 0, 1, 1, 2], [0], [0]>} : vector<2x8x8xf32>, vector<2x8x8xf32>, vector<2x8x8xf32> -> vector<2x8x8xf32>
    "tpu.trace_stop"() : () -> ()
    %174 = vector.shape_cast %173 : vector<2x8x8xf32> to vector<16x8xf32>
    %175 = vector.extract_strided_slice %17 {offsets = [0, 0], sizes = [8, 32], strides = [1, 1]} : vector<32x32xf32> to vector<8x32xf32>
    %cst_53 = arith.constant dense<0.000000e+00> : vector<16x32xf32>
    %176 = tpu.matmul %174, %175, %cst_53 {dimension_numbers = #tpu.dot_dimension_numbers<[1], [0], [0], [1], [0, 0, 1, 1], [], []>} : vector<16x8xf32>, vector<8x32xf32>, vector<16x32xf32> -> vector<16x32xf32>
    %177 = arith.addf %158, %176 : vector<16x32xf32>
    %178 = vector.extract_strided_slice %153 {offsets = [0, 0, 8], sizes = [2, 8, 8], strides = [1, 1, 1]} : vector<2x8x32xf32> to vector<2x8x8xf32>
    %179 = vector.extract_strided_slice %155 {offsets = [0, 0, 8], sizes = [2, 8, 8], strides = [1, 1, 1]} : vector<2x8x32xf32> to vector<2x8x8xf32>
    %180 = vector.extract_strided_slice %157 {offsets = [0, 0, 8], sizes = [2, 8, 8], strides = [1, 1, 1]} : vector<2x8x32xf32> to vector<2x8x8xf32>
    "tpu.trace_start"() <{level = 10 : i32, message = "bqd,bkd->bqk"}> : () -> ()
    %cst_54 = arith.constant dense<0.000000e+00> : vector<2x8x8xf32>
    %181 = tpu.matmul %178, %179, %cst_54 {dimension_numbers = #tpu.dot_dimension_numbers<[2], [2], [1], [1], [0, 0, 0, 1, 1, 1], [0], [0]>} : vector<2x8x8xf32>, vector<2x8x8xf32>, vector<2x8x8xf32> -> vector<2x8x8xf32>
    "tpu.trace_stop"() : () -> ()
    %cst_55 = arith.constant dense<0xFF800000> : vector<2x8xf32>
    %182 = vector.multi_reduction <maximumf>, %181, %cst_55 [2] : vector<2x8x8xf32> to vector<2x8xf32>
    %183 = vector.shape_cast %182 : vector<2x8xf32> to vector<2x8x1xf32>
    %184 = vector.broadcast %183 : vector<2x8x1xf32> to vector<2x8x8xf32>
    %185 = arith.subf %181, %184 : vector<2x8x8xf32>
    %186 = math.exp %185 : vector<2x8x8xf32>
    %cst_56 = arith.constant dense<0.000000e+00> : vector<2x8xf32>
    %187 = vector.multi_reduction <add>, %186, %cst_56 [2] : vector<2x8x8xf32> to vector<2x8xf32>
    %188 = vector.shape_cast %187 : vector<2x8xf32> to vector<2x8x1xf32>
    %189 = tpu.reciprocal %188 {approx = true} : vector<2x8x1xf32> -> vector<2x8x1xf32>
    %190 = vector.broadcast %189 : vector<2x8x1xf32> to vector<2x8x8xf32>
    %191 = arith.mulf %186, %190 : vector<2x8x8xf32>
    "tpu.trace_start"() <{level = 10 : i32, message = "bqk,bkd->bqd"}> : () -> ()
    %cst_57 = arith.constant dense<0.000000e+00> : vector<2x8x8xf32>
    %192 = tpu.matmul %191, %180, %cst_57 {dimension_numbers = #tpu.dot_dimension_numbers<[2], [1], [1], [2], [0, 0, 0, 1, 1, 2], [0], [0]>} : vector<2x8x8xf32>, vector<2x8x8xf32>, vector<2x8x8xf32> -> vector<2x8x8xf32>
    "tpu.trace_stop"() : () -> ()
    %193 = vector.shape_cast %192 : vector<2x8x8xf32> to vector<16x8xf32>
    %194 = vector.extract_strided_slice %17 {offsets = [8, 0], sizes = [8, 32], strides = [1, 1]} : vector<32x32xf32> to vector<8x32xf32>
    %cst_58 = arith.constant dense<0.000000e+00> : vector<16x32xf32>
    %195 = tpu.matmul %193, %194, %cst_58 {dimension_numbers = #tpu.dot_dimension_numbers<[1], [0], [0], [1], [0, 0, 1, 1], [], []>} : vector<16x8xf32>, vector<8x32xf32>, vector<16x32xf32> -> vector<16x32xf32>
    %196 = arith.addf %177, %195 : vector<16x32xf32>
    %197 = vector.extract_strided_slice %153 {offsets = [0, 0, 16], sizes = [2, 8, 8], strides = [1, 1, 1]} : vector<2x8x32xf32> to vector<2x8x8xf32>
    %198 = vector.extract_strided_slice %155 {offsets = [0, 0, 16], sizes = [2, 8, 8], strides = [1, 1, 1]} : vector<2x8x32xf32> to vector<2x8x8xf32>
    %199 = vector.extract_strided_slice %157 {offsets = [0, 0, 16], sizes = [2, 8, 8], strides = [1, 1, 1]} : vector<2x8x32xf32> to vector<2x8x8xf32>
    "tpu.trace_start"() <{level = 10 : i32, message = "bqd,bkd->bqk"}> : () -> ()
    %cst_59 = arith.constant dense<0.000000e+00> : vector<2x8x8xf32>
    %200 = tpu.matmul %197, %198, %cst_59 {dimension_numbers = #tpu.dot_dimension_numbers<[2], [2], [1], [1], [0, 0, 0, 1, 1, 1], [0], [0]>} : vector<2x8x8xf32>, vector<2x8x8xf32>, vector<2x8x8xf32> -> vector<2x8x8xf32>
    "tpu.trace_stop"() : () -> ()
    %cst_60 = arith.constant dense<0xFF800000> : vector<2x8xf32>
    %201 = vector.multi_reduction <maximumf>, %200, %cst_60 [2] : vector<2x8x8xf32> to vector<2x8xf32>
    %202 = vector.shape_cast %201 : vector<2x8xf32> to vector<2x8x1xf32>
    %203 = vector.broadcast %202 : vector<2x8x1xf32> to vector<2x8x8xf32>
    %204 = arith.subf %200, %203 : vector<2x8x8xf32>
    %205 = math.exp %204 : vector<2x8x8xf32>
    %cst_61 = arith.constant dense<0.000000e+00> : vector<2x8xf32>
    %206 = vector.multi_reduction <add>, %205, %cst_61 [2] : vector<2x8x8xf32> to vector<2x8xf32>
    %207 = vector.shape_cast %206 : vector<2x8xf32> to vector<2x8x1xf32>
    %208 = tpu.reciprocal %207 {approx = true} : vector<2x8x1xf32> -> vector<2x8x1xf32>
    %209 = vector.broadcast %208 : vector<2x8x1xf32> to vector<2x8x8xf32>
    %210 = arith.mulf %205, %209 : vector<2x8x8xf32>
    "tpu.trace_start"() <{level = 10 : i32, message = "bqk,bkd->bqd"}> : () -> ()
    %cst_62 = arith.constant dense<0.000000e+00> : vector<2x8x8xf32>
    %211 = tpu.matmul %210, %199, %cst_62 {dimension_numbers = #tpu.dot_dimension_numbers<[2], [1], [1], [2], [0, 0, 0, 1, 1, 2], [0], [0]>} : vector<2x8x8xf32>, vector<2x8x8xf32>, vector<2x8x8xf32> -> vector<2x8x8xf32>
    "tpu.trace_stop"() : () -> ()
    %212 = vector.shape_cast %211 : vector<2x8x8xf32> to vector<16x8xf32>
    %213 = vector.extract_strided_slice %17 {offsets = [16, 0], sizes = [8, 32], strides = [1, 1]} : vector<32x32xf32> to vector<8x32xf32>
    %cst_63 = arith.constant dense<0.000000e+00> : vector<16x32xf32>
    %214 = tpu.matmul %212, %213, %cst_63 {dimension_numbers = #tpu.dot_dimension_numbers<[1], [0], [0], [1], [0, 0, 1, 1], [], []>} : vector<16x8xf32>, vector<8x32xf32>, vector<16x32xf32> -> vector<16x32xf32>
    %215 = arith.addf %196, %214 : vector<16x32xf32>
    %216 = vector.extract_strided_slice %153 {offsets = [0, 0, 24], sizes = [2, 8, 8], strides = [1, 1, 1]} : vector<2x8x32xf32> to vector<2x8x8xf32>
    %217 = vector.extract_strided_slice %155 {offsets = [0, 0, 24], sizes = [2, 8, 8], strides = [1, 1, 1]} : vector<2x8x32xf32> to vector<2x8x8xf32>
    %218 = vector.extract_strided_slice %157 {offsets = [0, 0, 24], sizes = [2, 8, 8], strides = [1, 1, 1]} : vector<2x8x32xf32> to vector<2x8x8xf32>
    "tpu.trace_start"() <{level = 10 : i32, message = "bqd,bkd->bqk"}> : () -> ()
    %cst_64 = arith.constant dense<0.000000e+00> : vector<2x8x8xf32>
    %219 = tpu.matmul %216, %217, %cst_64 {dimension_numbers = #tpu.dot_dimension_numbers<[2], [2], [1], [1], [0, 0, 0, 1, 1, 1], [0], [0]>} : vector<2x8x8xf32>, vector<2x8x8xf32>, vector<2x8x8xf32> -> vector<2x8x8xf32>
    "tpu.trace_stop"() : () -> ()
    %cst_65 = arith.constant dense<0xFF800000> : vector<2x8xf32>
    %220 = vector.multi_reduction <maximumf>, %219, %cst_65 [2] : vector<2x8x8xf32> to vector<2x8xf32>
    %221 = vector.shape_cast %220 : vector<2x8xf32> to vector<2x8x1xf32>
    %222 = vector.broadcast %221 : vector<2x8x1xf32> to vector<2x8x8xf32>
    %223 = arith.subf %219, %222 : vector<2x8x8xf32>
    %224 = math.exp %223 : vector<2x8x8xf32>
    %cst_66 = arith.constant dense<0.000000e+00> : vector<2x8xf32>
    %225 = vector.multi_reduction <add>, %224, %cst_66 [2] : vector<2x8x8xf32> to vector<2x8xf32>
    %226 = vector.shape_cast %225 : vector<2x8xf32> to vector<2x8x1xf32>
    %227 = tpu.reciprocal %226 {approx = true} : vector<2x8x1xf32> -> vector<2x8x1xf32>
    %228 = vector.broadcast %227 : vector<2x8x1xf32> to vector<2x8x8xf32>
    %229 = arith.mulf %224, %228 : vector<2x8x8xf32>
    "tpu.trace_start"() <{level = 10 : i32, message = "bqk,bkd->bqd"}> : () -> ()
    %cst_67 = arith.constant dense<0.000000e+00> : vector<2x8x8xf32>
    %230 = tpu.matmul %229, %218, %cst_67 {dimension_numbers = #tpu.dot_dimension_numbers<[2], [1], [1], [2], [0, 0, 0, 1, 1, 2], [0], [0]>} : vector<2x8x8xf32>, vector<2x8x8xf32>, vector<2x8x8xf32> -> vector<2x8x8xf32>
    "tpu.trace_stop"() : () -> ()
    %231 = vector.shape_cast %230 : vector<2x8x8xf32> to vector<16x8xf32>
    %232 = vector.extract_strided_slice %17 {offsets = [24, 0], sizes = [8, 32], strides = [1, 1]} : vector<32x32xf32> to vector<8x32xf32>
    %cst_68 = arith.constant dense<0.000000e+00> : vector<16x32xf32>
    %233 = tpu.matmul %231, %232, %cst_68 {dimension_numbers = #tpu.dot_dimension_numbers<[1], [0], [0], [1], [0, 0, 1, 1], [], []>} : vector<16x8xf32>, vector<8x32xf32>, vector<16x32xf32> -> vector<16x32xf32>
    %234 = arith.addf %215, %233 : vector<16x32xf32>
    %235 = vector.broadcast %22 : vector<1x32xf32> to vector<16x32xf32>
    %236 = arith.addf %234, %235 : vector<16x32xf32>
    %237 = arith.addf %236, %151 : vector<16x32xf32>
    %cst_69 = arith.constant dense<0.000000e+00> : vector<16xf32>
    %238 = vector.multi_reduction <add>, %237, %cst_69 [1] : vector<16x32xf32> to vector<16xf32>
    %239 = vector.shape_cast %238 : vector<16xf32> to vector<16x1xf32>
    %cst_70 = arith.constant 3.200000e+01 : f32
    %240 = vector.broadcast %cst_70 : f32 to vector<16x1xf32>
    %241 = arith.divf %239, %240 : vector<16x1xf32>
    %242 = vector.broadcast %241 : vector<16x1xf32> to vector<16x32xf32>
    %243 = arith.subf %237, %242 : vector<16x32xf32>
    %244 = arith.mulf %243, %243 : vector<16x32xf32>
    %cst_71 = arith.constant dense<0.000000e+00> : vector<16xf32>
    %245 = vector.multi_reduction <add>, %244, %cst_71 [1] : vector<16x32xf32> to vector<16xf32>
    %246 = vector.shape_cast %245 : vector<16xf32> to vector<16x1xf32>
    %cst_72 = arith.constant 0.0322580636 : f32
    %247 = vector.broadcast %cst_72 : f32 to vector<16x1xf32>
    %248 = arith.mulf %246, %247 : vector<16x1xf32>
    %249 = math.sqrt %248 : vector<16x1xf32>
    %cst_73 = arith.constant 1.000000e-03 : f32
    %250 = vector.broadcast %cst_73 : f32 to vector<16x1xf32>
    %251 = arith.addf %249, %250 : vector<16x1xf32>
    %252 = vector.broadcast %251 : vector<16x1xf32> to vector<16x32xf32>
    %253 = arith.divf %243, %252 : vector<16x32xf32>
    %254 = vector.broadcast %23 : vector<1x32xf32> to vector<16x32xf32>
    %255 = arith.mulf %253, %254 : vector<16x32xf32>
    %256 = vector.broadcast %24 : vector<1x32xf32> to vector<16x32xf32>
    %257 = arith.addf %255, %256 : vector<16x32xf32>
    %cst_74 = arith.constant dense<0.000000e+00> : vector<16x64xf32>
    %258 = tpu.matmul %257, %15, %cst_74 {dimension_numbers = #tpu.dot_dimension_numbers<[1], [0], [0], [1], [0, 0, 1, 1], [], []>} : vector<16x32xf32>, vector<32x64xf32>, vector<16x64xf32> -> vector<16x64xf32>
    %259 = vector.broadcast %28 : vector<1x64xf32> to vector<16x64xf32>
    %260 = arith.addf %258, %259 : vector<16x64xf32>
    %cst_75 = arith.constant 0.000000e+00 : f32
    %261 = vector.broadcast %cst_75 : f32 to vector<16x64xf32>
    %262 = arith.maximumf %260, %261 : vector<16x64xf32>
    %cst_76 = arith.constant dense<0.000000e+00> : vector<16x32xf32>
    %263 = tpu.matmul %262, %18, %cst_76 {dimension_numbers = #tpu.dot_dimension_numbers<[1], [0], [0], [1], [0, 0, 1, 1], [], []>} : vector<16x64xf32>, vector<64x32xf32>, vector<16x32xf32> -> vector<16x32xf32>
    %264 = vector.broadcast %25 : vector<1x32xf32> to vector<16x32xf32>
    %265 = arith.addf %263, %264 : vector<16x32xf32>
    %266 = arith.addf %265, %257 : vector<16x32xf32>
    %cst_77 = arith.constant dense<0.000000e+00> : vector<16xf32>
    %267 = vector.multi_reduction <add>, %266, %cst_77 [1] : vector<16x32xf32> to vector<16xf32>
    %268 = vector.shape_cast %267 : vector<16xf32> to vector<16x1xf32>
    %cst_78 = arith.constant 3.200000e+01 : f32
    %269 = vector.broadcast %cst_78 : f32 to vector<16x1xf32>
    %270 = arith.divf %268, %269 : vector<16x1xf32>
    %271 = vector.broadcast %270 : vector<16x1xf32> to vector<16x32xf32>
    %272 = arith.subf %266, %271 : vector<16x32xf32>
    %273 = arith.mulf %272, %272 : vector<16x32xf32>
    %cst_79 = arith.constant dense<0.000000e+00> : vector<16xf32>
    %274 = vector.multi_reduction <add>, %273, %cst_79 [1] : vector<16x32xf32> to vector<16xf32>
    %275 = vector.shape_cast %274 : vector<16xf32> to vector<16x1xf32>
    %cst_80 = arith.constant 0.0322580636 : f32
    %276 = vector.broadcast %cst_80 : f32 to vector<16x1xf32>
    %277 = arith.mulf %275, %276 : vector<16x1xf32>
    %278 = math.sqrt %277 : vector<16x1xf32>
    %cst_81 = arith.constant 1.000000e-03 : f32
    %279 = vector.broadcast %cst_81 : f32 to vector<16x1xf32>
    %280 = arith.addf %278, %279 : vector<16x1xf32>
    %281 = vector.broadcast %280 : vector<16x1xf32> to vector<16x32xf32>
    %282 = arith.divf %272, %281 : vector<16x32xf32>
    %283 = vector.broadcast %26 : vector<1x32xf32> to vector<16x32xf32>
    %284 = arith.mulf %282, %283 : vector<16x32xf32>
    %285 = vector.broadcast %27 : vector<1x32xf32> to vector<16x32xf32>
    %286 = arith.addf %284, %285 : vector<16x32xf32>
    %287 = vector.shape_cast %286 : vector<16x32xf32> to vector<2x8x32xf32>
    %c0_82 = arith.constant 0 : index
    %c0_83 = arith.constant 0 : index
    %c0_84 = arith.constant 0 : index
    %288 = vector.load %arg8[%c0_82, %c0_83, %c0_84] : memref<2x8x32xf32, #tpu.memory_space<vmem>>, vector<2x8x32xf32>
    tpu.vector_store %arg8[%c0_82, %c0_83, %c0_84], %287 {strides = array<i32>} : memref<2x8x32xf32, #tpu.memory_space<vmem>>, vector<2x8x32xf32>,
    %c1_i32 = arith.constant 1 : i32
    %289 = arith.cmpi eq, %arg0, %c1_i32 : i32
    %290 = arith.extui %289 : i1 to i32
    %c0_i32_85 = arith.constant 0 : i32
    %291 = arith.cmpi ne, %290, %c0_i32_85 : i32
    scf.if %291 {
      %c0_86 = arith.constant 0 : index
      %c0_87 = arith.constant 0 : index
      %c0_88 = arith.constant 0 : index
      %292 = vector.load %arg7[%c0_86, %c0_87, %c0_88] : memref<2x8x32xf32, #tpu.memory_space<vmem>>, vector<2x8x32xf32>
      tpu.vector_store %arg7[%c0_86, %c0_87, %c0_88], %287 {strides = array<i32>} : memref<2x8x32xf32, #tpu.memory_space<vmem>>, vector<2x8x32xf32>,
    } else {
    }
    return
  }
  func.func @transform_0(%arg0: i32) -> (i32, i32) {
    %c0_i32 = arith.constant 0 : i32
    %c0_i32_0 = arith.constant 0 : i32
    %c0_i32_1 = arith.constant 0 : i32
    return %c0_i32, %c0_i32_0 : i32, i32
  }
  func.func @transform_1(%arg0: i32) -> (i32, i32, i32) {
    %c0_i32 = arith.constant 0 : i32
    %c0_i32_0 = arith.constant 0 : i32
    %c0_i32_1 = arith.constant 0 : i32
    %c0_i32_2 = arith.constant 0 : i32
    return %c0_i32, %c0_i32_0, %c0_i32_1 : i32, i32, i32
  }
  func.func @transform_2(%arg0: i32) -> (i32, i32) {
    %c0_i32 = arith.constant 0 : i32
    %c0_i32_0 = arith.constant 0 : i32
    %c0_i32_1 = arith.constant 0 : i32
    return %c0_i32, %c0_i32_0 : i32, i32
  }
  func.func @transform_3(%arg0: i32) -> (i32, i32, i32) {
    %c0_i32 = arith.constant 0 : i32
    %c0_i32_0 = arith.constant 0 : i32
    %c0_i32_1 = arith.constant 0 : i32
    return %arg0, %c0_i32, %c0_i32_0 : i32, i32, i32
  }
  func.func @transform_4(%arg0: i32) -> (i32, i32, i32) {
    %c0_i32 = arith.constant 0 : i32
    %c0_i32_0 = arith.constant 0 : i32
    %c0_i32_1 = arith.constant 0 : i32
    return %arg0, %c0_i32, %c0_i32_0 : i32, i32, i32
  }
  func.func @transform_5(%arg0: i32) -> (i32, i32, i32) {
    %c0_i32 = arith.constant 0 : i32
    %c0_i32_0 = arith.constant 0 : i32
    %c0_i32_1 = arith.constant 0 : i32
    return %arg0, %c0_i32, %c0_i32_0 : i32, i32, i32
  }
  func.func @transform_6(%arg0: i32) -> (i32, i32, i32) {
    %c0_i32 = arith.constant 0 : i32
    %c0_i32_0 = arith.constant 0 : i32
    %c0_i32_1 = arith.constant 0 : i32
    %c0_i32_2 = arith.constant 0 : i32
    return %c0_i32, %c0_i32_0, %c0_i32_1 : i32, i32, i32
  }
}

</mosaic_0001>

<bundles_post_ra>
// kernel: tpu_custom_call.1
= control target key start
LH: loop header
LB: loop body
LE: loop exit
PB: predicated region body
PF: predicated region fallthrough
CT: control target
= control target key end

     0   :  { %11 = vsyncpa [#allocation4], 0  ;;  %s5296_s21 = smov 0   ;;  %s5890_s0 = inlined_call_operand.vmem [shape: f32[8,32], index: 0, kind: input, shape index: {}]   ;;  %s5891_s1 = inlined_call_operand.vmem [shape: f32[2,8,32], index: 1, kind: input, shape index: {}]   ;;  %s5892_s2 = inlined_call_operand.vmem [shape: f32[8,8], index: 2, kind: input, shape index: {}]   ;;  %s5893_s3 = inlined_call_operand.vmem [shape: f32[2,32,256], index: 3, kind: input, shape index: {}]   ;;  %s5894_s4 = inlined_call_operand.vmem [shape: f32[2,128,32], index: 4, kind: input, shape index: {}]   ;;  %s5895_s5 = inlined_call_operand.vmem [shape: f32[2,10,64], index: 5, kind: input, shape index: {}]   ;;  %s5896_s6 = inlined_call_operand.hbm [shape: f32[2,8,32], index: 6, kind: output, shape index: {}]  }
   0x1 LB: > { %s5302_s22 = sadd.s32 4294967295, %s5248_s21   ;;  %p4568_p0 = scmp.ge.s32.totalorder %s5248_s21, 1  ;;  %s5248_s21 = sphi %s5296_s21, %s17_s21  }
   0x2   : > { %p228_p1 = scmp.lt.s32.totalorder %s5248_s21, 3 }
   0x4   : > { %p229_p2 = pnand %p4568_p0, %p228_p1 }
   0x5   : > { %p263_p3 = scmp.lt.s32.totalorder (!%p229_p2), %s5302_s22, 1  ;;  %p4575_p4 = scmp.ne.s32.totalorder (!%p229_p2), %s5302_s22, 0 }
   0x6   : > { %232 = sbr.rel (%p229_p2) target bundleno = 7580 (0x1d9c), region = 44 }
   0xb   : > { %s264_s23 = scalar_select %p263_p3, %s5302_s22, 1 }
   0xc   : > { %281 = sbr.rel (%p4575_p4) target bundleno = 19 (0x13), region = 48 }
   0xd   : > { %s4661_s24 = sshll.u32 %s264_s23, 6  ;;  %s4662_s25 = sshll.u32 %s264_s23, 7 }
   0xe   : > { %s5311_s28 = scalar_lea.vmem %s5893_s3, %s4661_s24  ;;  %s5316_s7 = scalar_lea.vmem %s5894_s4, %s4662_s25 }
   0xf   : > { %s4663_s8 = sshll.u32 %s264_s23, 4 }
  0x10   : > { %s5321_s11 = scalar_lea.vmem %s5895_s5, %s4663_s8 }
  0x11   : > { %v282_v0 = vld [vmem:[%s5890_s0] sm:$0xff]  ;;  %vm283_vm0 = vcmask 261120  }
  0x12   : > { %284 = vst.msk [vmem:[#allocation2] sm:$0xff] %vm283_vm0, %v282_v0  ;;  %287 = vst.msk [vmem:[#allocation2 + $0x8] sm:$0xff] %vm283_vm0, %v282_v0 }
  0x13 PF: > { %v5328_v1 = vld [vmem:[%s5311_s28 + $0x30] sm:$0xff]  ;;  %vm319_vm1 = vcmask 261120   ;;  %s5250_s14 = smov 96   ;;  %v5340_v4 = vld [vmem:[%s5311_s28 + $0x20] sm:$0xff]  ;;  %s5251_s15 = smov 64   ;;  %v5252_v15 = vmov 0.0  }
  0x14   : > { %v5331_v2 = vld [vmem:[%s5311_s28 + $0x10] sm:$0xff]  ;;  %411 = vrot.lane.b32.xlu0 %v5328_v1, %s5250_s14  ;;  %v5343_v5 = vld [vmem:[%s5311_s28] sm:$0xff]  ;;  %4804 = vmatprep.subr.mxu0 %v5328_v1  ;;  %vm5253_vm2 = vmmov 0   ;;  %vm579_vm3 = vcmask 64512   ;;  %s5254_s18 = smov 120   ;;  %s5255_s19 = smov 112  }
  0x15   : > { %407 = vrot.lane.b32.xlu1 %v5331_v2, %s5250_s14  ;;  %4805 = vmatpush3.msra.mxu0 %v5328_v1  ;;  %v5418_v22 = vld [vmem:[%s5892_s2] sm:$0xff]  ;;  %s5256_s20 = smov 104   ;;  %s5257_s23 = smov 32   ;;  %vm4349_vm12 = vcmask 523264  }
  0x16   : > { %4806 = vmatprep.subr.mxu0 %v5340_v4  ;;  %p4656_p5 = scmp.ne.s32.totalorder %s5302_s22, 1 }
  0x17   : > { %4807 = vmatpush3.msra.mxu0 %v5340_v4 }
  0x18   : > { %409 = vrot.lane.b32.xlu0 %v5340_v4, %s5250_s14  ;;  %4808 = vmatprep.subr.mxu0 %v5331_v2 }
  0x19   : > { %v5337_v3 = vld [vmem:[#allocation2] sm:$0xff]  ;;  %405 = vrot.lane.b32.xlu1 %v5343_v5, %s5250_s14  ;;  %4809 = vmatpush3.msra.mxu0 %v5331_v2  ;;  %v5359_v6 = vld [vmem:[#allocation2 + $0x8] sm:$0xff] }
  0x1a   : > { %4823 = vmatprep.mubr.msk.f32.mxu1 %vm319_vm1, %v5337_v3  ;;  %4812 = vmatprep.mubr.msk.f32.mxu0 %vm319_vm1, %v5337_v3 }
  0x1b   : > { %4810 = vmatprep.subr.mxu0 %v5343_v5 }
  0x1c   : > { %498 = vrot.lane.b32.xlu0 %v5328_v1, %s5251_s15  ;;  %4811 = vmatpush3.msra.mxu0 %v5343_v5 }
  0x1d   : > { %496 = vrot.lane.b32.xlu1 %v5340_v4, %s5251_s15  ;;  %4813 = vmatmul.mubr.msk.f32.vlgmr.msra.gmra.mxu0 %vm319_vm1, %v5359_v6 }
  0x1e   : > { %4834 = vmatprep.mubr.msk.f32.mxu0 %vm319_vm1, %v5337_v3 }
  0x20   : > { %494 = vrot.lane.b32.xlu0 %v5331_v2, %s5251_s15 }
  0x21   : > { %492 = vrot.lane.b32.xlu1 %v5343_v5, %s5251_s15 }
  0x86   : > { %v412_v7 = vpop.permute.xlu0 %411 }
  0x87   : > { %v408_v8 = vpop.permute.xlu1 %407  ;;  %4815 = vmatprep.subr.mxu1 %v412_v7 }
  0x88   : > { %4816 = vmatpush3.msra.mxu1 %v412_v7 }
  0x8a   : > { %v410_v9 = vpop.permute.xlu0 %409 }
  0x8b   : > { %4817 = vmatprep.subr.mxu1 %v410_v9  ;;  %v406_v10 = vpop.permute.xlu1 %405 }
  0x8c   : > { %4818 = vmatpush3.msra.mxu1 %v410_v9 }
  0x8d   : > { %4819 = vmatprep.subr.mxu1 %v408_v8 }
  0x8e   : > { %4820 = vmatpush3.msra.mxu1 %v408_v8  ;;  %v499_v11 = vpop.permute.xlu0 %498 }
  0x8f   : > { %4821 = vmatprep.subr.mxu1 %v406_v10  ;;  %4826 = vmatprep.subr.mxu0 %v499_v11  ;;  %v497_v12 = vpop.permute.xlu1 %496 }
  0x90   : > { %4822 = vmatpush3.msra.mxu1 %v406_v10  ;;  %4827 = vmatpush3.msra.mxu0 %v499_v11 }
  0x91   : > { %4824 = vmatmul.mubr.msk.f32.vlgmr.msra.gmra.mxu1 %vm319_vm1, %v5359_v6  ;;  %4828 = vmatprep.subr.mxu0 %v497_v12 }
  0x92   : > { %v495_v13 = vpop.permute.xlu0 %494  ;;  %4829 = vmatpush3.msra.mxu0 %v497_v12  ;;  %4842 = vmatprep.subr.mxu1 %v5252_v15 }
  0x93   : > { %4830 = vmatprep.subr.mxu0 %v495_v13  ;;  %v493_v14 = vpop.permute.xlu1 %492  ;;  %4844 = vmatprep.mubr.msk.f32.mxu1 %vm5253_vm2, %v5252_v15 }
  0x94   : > { %4831 = vmatpush3.msra.mxu0 %v495_v13 }
  0x95   : > { %4832 = vmatprep.subr.mxu0 %v493_v14 }
  0x96   : > { %4833 = vmatpush3.msra.mxu0 %v493_v14 }
  0x97   : > { %4835 = vmatmul.mubr.msk.f32.vlgmr.msra.gmra.mxu0 %vm319_vm1, %v5359_v6  ;;  %4837 = vmatprep.subr.mxu0 %v5252_v15 }
  0x98   : > { %4839 = vmatprep.mubr.msk.f32.mxu0 %vm5253_vm2, %v5252_v15 }
  0xdd   : > { %v5387_v17 = vpop.f32.mrf.mxu0 }
  0xdf   : > { %v5396_v19 = vpop.f32.mrf.mxu0 }
 0x151   : > { %v5385_v16 = vpop.f32.mrf.mxu1 }
 0x152   : > { %4843 = vmatpush3.xpose.msk.msra.mxu1 %vm579_vm3, %v5385_v16 }
 0x153   : > { %v5391_v18 = vpop.f32.mrf.mxu1  ;;  %4852 = vmatprep.subr.mxu1 %v5252_v15 }
 0x154   : > { %4838 = vmatpush3.xpose.msk.msra.mxu0 %vm579_vm3, %v5391_v18 }
 0x155   : > { %4845 = vmatmul.mubr.msk.f32.vlgmr.msra.gmra.mxu1 %vm579_vm3, %v5387_v17  ;;  %4847 = vmatprep.subr.mxu0 %v5252_v15 }
 0x156   : > { %4854 = vmatprep.mubr.msk.f32.mxu1 %vm5253_vm2, %v5252_v15 }
 0x157   : > { %4840 = vmatmul.mubr.msk.f32.vlgmr.msra.gmra.mxu0 %vm579_vm3, %v5396_v19  ;;  %v5405_v20 = vpop.f32.mrf.mxu0 }
 0x158   : > { %4853 = vmatpush3.msra.mxu1 %v5405_v20  ;;  %4849 = vmatprep.mubr.msk.f32.mxu0 %vm5253_vm2, %v5252_v15 }
 0x159   : > { %v5410_v21 = vpop.f32.mrf.mxu0  ;;  %4862 = vmatprep.subr.mxu1 %v5252_v15 }
 0x15a   : > { %4848 = vmatpush3.msra.mxu0 %v5410_v21 }
 0x15b   : > { %4857 = vmatprep.subr.mxu0 %v5252_v15 }
 0x215   : > { %v728_v23 = vpop.f32.mrf.mxu1 }
 0x216   : > { %v729_v24 = vadd.f32 %v728_v23, %v5418_v22 }
 0x217   : > { %v652_v25 = vpop.f32.mrf.mxu0  ;;  %v4846_v26 = vpop.f32.mrf.mxu1 }
 0x218   : > { %v653_v27 = vadd.f32 %v652_v25, %v5418_v22  ;;  %v735_v28 = vsel %vm579_vm3, %v729_v24, -inf  ;;  %v296_v26 = vld [vmem:[%s5316_s7] sm:$0xff] }
 0x219   : > { %736 = vmax.xlane.f32.xlu1 %v735_v28  ;;  %v4841_v29 = vpop.f32.mrf.mxu0 }
 0x21a   : > { %v732_v30 = vsel %vm579_vm3, %v653_v27, -inf }
 0x21b   : > { %733 = vmax.xlane.f32.xlu0 %v732_v30 }
 0x22a   : > { %902 = vrot.lane.b32.xlu1 %v5391_v18, %s5254_s18 }
 0x22e   : > { %900 = vrot.lane.b32.xlu1 %v5396_v19, %s5254_s18 }
 0x232   : > { %978 = vrot.lane.b32.xlu1 %v5387_v17, %s5254_s18 }
 0x2a2   : > { %v737_v31 = vpop.xlane.xlu1 %736 }
 0x2a3   : > { %v739_v32 = vsub.f32 %v729_v24, %v737_v31 }
 0x2a4   : > { %v734_v33 = vpop.xlane.xlu0 %733 }
 0x2a5   : > { %v742_v34 = vmul.f32 1.442695, %v739_v32  ;;  %v738_v35 = vsub.f32 %v653_v27, %v734_v33 }
 0x2a6   : > { %v903_v43 = vpop.permute.xlu1 %902 }
 0x2a7   : > { %5125 = vpow2.f32 %v742_v34  ;;  %v740_v36 = vmul.f32 1.442695, %v738_v35  ;;  %v297_v35 = vld [vmem:[%s5316_s7 + $0x8] sm:$0xff] }
 0x2a9   : > { %5127 = vpow2.f32 %v740_v36 }
 0x2aa   : > { %v901_v45 = vpop.permute.xlu1 %900 }
 0x2ae   : > { %v979_v50 = vpop.permute.xlu1 %978 }
 0x2b4   : > { %v5126_v37 = vpop.eup %5125 }
 0x2b5   : > { %v747_v38 = vsel %vm579_vm3, %v5126_v37, 0.0 }
 0x2b6   : > { %v5128_v39 = vpop.eup %5127  ;;  %748 = vadd.xlane.f32.xlu0 %v747_v38 }
 0x2b7   : > { %v744_v40 = vsel %vm579_vm3, %v5128_v39, 0.0 }
 0x2ba   : > { %745 = vadd.xlane.f32.xlu0 %v744_v40 }
 0x2d0   : > { %980 = vrot.lane.b32.xlu0 %v5385_v16, %s5254_s18 }
 0x33f   : > { %v749_v41 = vpop.xlane.xlu0 %748 }
 0x340   : > { %5129 = vrcp.f32 %v749_v41 }
 0x343   : > { %v746_v42 = vpop.xlane.xlu0 %745 }
 0x344   : > { %5131 = vrcp.f32 %v746_v42 }
 0x347   : > { %v981_v47 = vpop.permute.xlu0 %980 }
 0x34d   : > { %v5130_v44 = vpop.eup %5129 }
 0x34e   : > { %v753_v46 = vmul.f32 %v5130_v44, %v5126_v37 }
 0x350   : > { %4855 = vmatmul.mubr.msk.f32.vlgmr.msra.gmra.mxu1 %vm579_vm3, %v753_v46 }
 0x351   : > { %v5132_v48 = vpop.eup %5131  ;;  %4863 = vmatpush3.xpose.msk.msra.mxu1 %vm579_vm3, %v981_v47  ;;  %4864 = vmatprep.mubr.msk.f32.mxu1 %vm5253_vm2, %v5252_v15 }
 0x352   : > { %v752_v49 = vmul.f32 %v5132_v48, %v5128_v39  ;;  %4872 = vmatprep.subr.mxu1 %v5252_v15 }
 0x354   : > { %4850 = vmatmul.mubr.msk.f32.vlgmr.msra.gmra.mxu0 %vm579_vm3, %v752_v49  ;;  %4865 = vmatmul.mubr.msk.f32.vlgmr.msra.gmra.mxu1 %vm579_vm3, %v979_v50 }
 0x355   : > { %4858 = vmatpush3.xpose.msk.msra.mxu0 %vm579_vm3, %v903_v43  ;;  %4859 = vmatprep.mubr.msk.f32.mxu0 %vm5253_vm2, %v5252_v15 }
 0x356   : > { %4867 = vmatprep.subr.mxu0 %v5252_v15  ;;  %4874 = vmatprep.mubr.msk.f32.mxu1 %vm5253_vm2, %v5252_v15 }
 0x358   : > { %4860 = vmatmul.mubr.msk.f32.vlgmr.msra.gmra.mxu0 %vm579_vm3, %v901_v45 }
 0x359   : > { %4869 = vmatprep.mubr.msk.f32.mxu0 %vm5253_vm2, %v5252_v15 }
 0x410   : > { %v896_v51 = vpop.f32.mrf.mxu1 }
 0x412   : > { %v4856_v52 = vpop.f32.mrf.mxu1 }
 0x414   : > { %v823_v53 = vpop.f32.mrf.mxu0  ;;  %v1052_v54 = vpop.f32.mrf.mxu1 }
 0x415   : > { %v1053_v55 = vadd.f32 %v1052_v54, %v5418_v22 }
 0x416   : > { %v4851_v56 = vpop.f32.mrf.mxu0  ;;  %v4866_v57 = vpop.f32.mrf.mxu1 }
 0x417   : > { %v1059_v58 = vsel %vm579_vm3, %v1053_v55, -inf }
 0x418   : > { %1060 = vmax.xlane.f32.xlu1 %v1059_v58  ;;  %v974_v59 = vpop.f32.mrf.mxu0 }
 0x419   : > { %v975_v60 = vadd.f32 %v974_v59, %v5418_v22 }
 0x41a   : > { %v4861_v61 = vpop.f32.mrf.mxu0 }
 0x41b   : > { %v1056_v62 = vsel %vm579_vm3, %v975_v60, -inf }
 0x41c   : > { %1057 = vmax.xlane.f32.xlu0 %v1056_v62 }
 0x429   : > { %1079 = vrot.lane.b32.xlu1 %v5410_v21, %s5254_s18 }
 0x42d   : > { %1396 = vrot.lane.b32.xlu1 %v5391_v18, %s5255_s19 }
 0x431   : > { %1474 = vrot.lane.b32.xlu1 %v5385_v16, %s5255_s19 }
 0x435   : > { %1472 = vrot.lane.b32.xlu1 %v5387_v17, %s5255_s19 }
 0x4a1   : > { %v1061_v63 = vpop.xlane.xlu1 %1060 }
 0x4a2   : > { %v1063_v0 = vsub.f32 %v1053_v55, %v1061_v63 }
 0x4a4   : > { %v1066_v7 = vmul.f32 1.442695, %v1063_v0 }
 0x4a5   : > { %v1080_v8 = vpop.permute.xlu1 %1079  ;;  %v1058_v9 = vpop.xlane.xlu0 %1057 }
 0x4a6   : > { %5133 = vpow2.f32 %v1066_v7  ;;  %v1062_v10 = vsub.f32 %v975_v60, %v1058_v9  ;;  %4868 = vmatpush3.msra.mxu0 %v1080_v8 }
 0x4a7   : > { %4877 = vmatprep.subr.mxu0 %v297_v35 }
 0x4a8   : > { %v1064_v11 = vmul.f32 1.442695, %v1062_v10 }
 0x4a9   : > { %v1397_v28 = vpop.permute.xlu1 %1396 }
 0x4aa   : > { %5135 = vpow2.f32 %v1064_v11  ;;  %v298_v11 = vld [vmem:[%s5316_s7 + $0x10] sm:$0xff] }
 0x4ad   : > { %v1475_v32 = vpop.permute.xlu1 %1474 }
 0x4b1   : > { %v1473_v34 = vpop.permute.xlu1 %1472 }
 0x4b3   : > { %v5134_v12 = vpop.eup %5133 }
 0x4b4   : > { %v1071_v13 = vsel %vm579_vm3, %v5134_v12, 0.0 }
 0x4b5   : > { %1072 = vadd.xlane.f32.xlu0 %v1071_v13 }
 0x4b7   : > { %v5136_v14 = vpop.eup %5135 }
 0x4b8   : > { %v1068_v23 = vsel %vm579_vm3, %v5136_v14, 0.0 }
 0x4b9   : > { %1069 = vadd.xlane.f32.xlu0 %v1068_v23 }
 0x4cf   : > { %1156 = vrot.lane.b32.xlu0 %v5405_v20, %s5254_s18 }
 0x4d3   : > { %1394 = vrot.lane.b32.xlu0 %v5396_v19, %s5255_s19 }
 0x53e   : > { %v1073_v24 = vpop.xlane.xlu0 %1072 }
 0x53f   : > { %5137 = vrcp.f32 %v1073_v24 }
 0x542   : > { %v1070_v25 = vpop.xlane.xlu0 %1069 }
 0x543   : > { %5139 = vrcp.f32 %v1070_v25 }
 0x546   : > { %v1157_v27 = vpop.permute.xlu0 %1156 }
 0x547   : > { %4873 = vmatpush3.msra.mxu1 %v1157_v27 }
 0x548   : > { %4882 = vmatprep.subr.mxu1 %v296_v26 }
 0x54a   : > { %v1395_v43 = vpop.permute.xlu0 %1394 }
 0x54c   : > { %v5138_v29 = vpop.eup %5137 }
 0x54d   : > { %v1077_v30 = vmul.f32 %v5138_v29, %v5134_v12 }
 0x54f   : > { %4875 = vmatmul.mubr.msk.f32.vlgmr.msra.gmra.mxu1 %vm579_vm3, %v1077_v30 }
 0x550   : > { %v5140_v31 = vpop.eup %5139  ;;  %4884 = vmatprep.mubr.msk.f32.mxu1 %vm579_vm3, %v823_v53  ;;  %4883 = vmatpush3.msra.mxu1 %v296_v26 }
 0x551   : > { %4892 = vmatprep.subr.mxu1 %v5252_v15  ;;  %v1076_v33 = vmul.f32 %v5140_v31, %v5136_v14 }
 0x553   : > { %4870 = vmatmul.mubr.msk.f32.vlgmr.msra.gmra.mxu0 %vm579_vm3, %v1076_v33  ;;  %4885 = vmatmul.mubr.msk.f32.vlgmr.msra.gmra.mxu1 %vm579_vm3, %v896_v51 }
 0x554   : > { %4893 = vmatpush3.xpose.msk.msra.mxu1 %vm579_vm3, %v1475_v32  ;;  %4894 = vmatprep.mubr.msk.f32.mxu1 %vm5253_vm2, %v5252_v15 }
 0x555   : > { %4902 = vmatprep.subr.mxu1 %v5252_v15  ;;  %4878 = vmatpush3.msra.mxu0 %v297_v35 }
 0x556   : > { %4887 = vmatprep.subr.mxu0 %v5252_v15 }
 0x557   : > { %4895 = vmatmul.mubr.msk.f32.vlgmr.msra.gmra.mxu1 %vm579_vm3, %v1473_v34 }
 0x558   : > { %4904 = vmatprep.mubr.msk.f32.mxu1 %vm5253_vm2, %v5252_v15 }
 0x60f   : > { %v1228_v36 = vpop.f32.mrf.mxu1 }
 0x611   : > { %v4876_v37 = vpop.f32.mrf.mxu1 }
 0x613   : > { %v1151_v38 = vpop.f32.mrf.mxu0  ;;  %v5483_v39 = vpop.f32.mrf.mxu1 }
 0x614   : > { %4879 = vmatprep.mubr.msk.f32.mxu0 %vm579_vm3, %v1151_v38 }
 0x615   : > { %v4871_v40 = vpop.f32.mrf.mxu0  ;;  %4880 = vmatmul.mubr.msk.f32.vlgmr.msra.gmra.mxu0 %vm579_vm3, %v1228_v36  ;;  %v5487_v41 = vpop.f32.mrf.mxu1 }
 0x616   : > { %4888 = vmatpush3.xpose.msk.msra.mxu0 %vm579_vm3, %v1397_v28  ;;  %4889 = vmatprep.mubr.msk.f32.mxu0 %vm5253_vm2, %v5252_v15 }
 0x617   : > { %v1546_v42 = vpop.f32.mrf.mxu1  ;;  %4897 = vmatprep.subr.mxu0 %v5252_v15 }
 0x618   : > { %v1547_v44 = vadd.f32 %v1546_v42, %v5418_v22 }
 0x619   : > { %4890 = vmatmul.mubr.msk.f32.vlgmr.msra.gmra.mxu0 %vm579_vm3, %v1395_v43  ;;  %v4896_v45 = vpop.f32.mrf.mxu1 }
 0x61a   : > { %v1553_v46 = vsel %vm579_vm3, %v1547_v44, -inf  ;;  %4899 = vmatprep.mubr.msk.f32.mxu0 %vm5253_vm2, %v5252_v15 }
 0x61b   : > { %1554 = vmax.xlane.f32.xlu1 %v1553_v46 }
 0x62c   : > { %1572 = vrot.lane.b32.xlu1 %v5410_v21, %s5255_s19 }
 0x630   : > { %1809 = vrot.lane.b32.xlu1 %v5391_v18, %s5256_s20 }
 0x634   : > { %1887 = vrot.lane.b32.xlu1 %v5385_v16, %s5256_s20 }
 0x638   : > { %1885 = vrot.lane.b32.xlu1 %v5387_v17, %s5256_s20 }
 0x6a4   : > { %v1555_v47 = vpop.xlane.xlu1 %1554 }
 0x6a5   : > { %v1557_v49 = vsub.f32 %v1547_v44, %v1555_v47 }
 0x6a7   : > { %v1560_v50 = vmul.f32 1.442695, %v1557_v49 }
 0x6a8   : > { %v1573_v48 = vpop.permute.xlu1 %1572 }
 0x6a9   : > { %4898 = vmatpush3.msra.mxu0 %v1573_v48  ;;  %5141 = vpow2.f32 %v1560_v50 }
 0x6aa   : > { %4907 = vmatprep.subr.mxu0 %v298_v11 }
 0x6ac   : > { %v1810_v8 = vpop.permute.xlu1 %1809 }
 0x6b0   : > { %v1888_v26 = vpop.permute.xlu1 %1887 }
 0x6b4   : > { %v1886_v29 = vpop.permute.xlu1 %1885 }
 0x6b6   : > { %v5142_v16 = vpop.eup %5141 }
 0x6b7   : > { %v1565_v17 = vsel %vm579_vm3, %v5142_v16, 0.0 }
 0x6d5   : > { %v5506_v51 = vpop.f32.mrf.mxu0 }
 0x6d6   : > { %v1391_v35 = vadd.f32 %v5483_v39, %v5506_v51 }
 0x6d7   : > { %v5508_v52 = vpop.f32.mrf.mxu0 }
 0x6d8   : > { %v1386_v37 = vadd.f32 %v5487_v41, %v5508_v52 }
 0x6d9   : > { %v1468_v53 = vpop.f32.mrf.mxu0 }
 0x6da   : > { %v1469_v54 = vadd.f32 %v1468_v53, %v5418_v22 }
 0x6db   : > { %v4891_v18 = vpop.f32.mrf.mxu0 }
 0x6dc   : > { %v1550_v55 = vsel %vm579_vm3, %v1469_v54, -inf }
 0x6dd   : > { %1551 = vmax.xlane.f32.xlu0 %v1550_v55 }
 0x6e1   : > { %1566 = vadd.xlane.f32.xlu0 %v1565_v17 }
 0x766   : > { %v1552_v56 = vpop.xlane.xlu0 %1551 }
 0x767   : > { %v1556_v57 = vsub.f32 %v1469_v54, %v1552_v56 }
 0x769   : > { %v1558_v58 = vmul.f32 1.442695, %v1556_v57  ;;  %v2220_v57 = vlaneseq }
 0x76a   : > { %v1567_v61 = vpop.xlane.xlu0 %1566 }
 0x76b   : > { %5143 = vpow2.f32 %v1558_v58  ;;  %v5558_v58 = vshrl.u32 %v2220_v57, 7 }
 0x76c   : > { %5145 = vrcp.f32 %v1567_v61 }
 0x778   : > { %v5144_v59 = vpop.eup %5143 }
 0x779   : > { %v1562_v60 = vsel %vm579_vm3, %v5144_v59, 0.0  ;;  %v5146_v63 = vpop.eup %5145 }
 0x77a   : > { %1563 = vadd.xlane.f32.xlu0 %v1562_v60  ;;  %v1571_v7 = vmul.f32 %v5146_v63, %v5142_v16  ;;  %v5562_v60 = vld [vmem:[%s5321_s11] sm:$0xff] }
 0x790   : > { %1648 = vrot.lane.b32.xlu0 %v5405_v20, %s5255_s19 }
 0x794   : > { %1807 = vrot.lane.b32.xlu0 %v5396_v19, %s5256_s20 }
 0x803   : > { %v1564_v62 = vpop.xlane.xlu0 %1563 }
 0x804   : > { %5147 = vrcp.f32 %v1564_v62 }
 0x807   : > { %v1649_v0 = vpop.permute.xlu0 %1648 }
 0x808   : > { %4903 = vmatpush3.msra.mxu1 %v1649_v0 }
 0x809   : > { %4905 = vmatmul.mubr.msk.f32.vlgmr.msra.gmra.mxu1 %vm579_vm3, %v1571_v7  ;;  %4912 = vmatprep.subr.mxu1 %v5252_v15 }
 0x80a   : > { %4913 = vmatpush3.xpose.msk.msra.mxu1 %vm579_vm3, %v1810_v8  ;;  %4914 = vmatprep.mubr.msk.f32.mxu1 %vm5253_vm2, %v5252_v15 }
 0x80b   : > { %v1808_v19 = vpop.permute.xlu0 %1807  ;;  %4922 = vmatprep.subr.mxu1 %v5252_v15 }
 0x80d   : > { %4915 = vmatmul.mubr.msk.f32.vlgmr.msra.gmra.mxu1 %vm579_vm3, %v1808_v19 }
 0x80e   : > { %4924 = vmatprep.mubr.msk.f32.mxu1 %vm5253_vm2, %v5252_v15 }
 0x811   : > { %v5148_v9 = vpop.eup %5147 }
 0x812   : > { %v1570_v10 = vmul.f32 %v5148_v9, %v5144_v59  ;;  %v2222_v59 = vsub.s32 0, %v5558_v58 }
 0x814   : > { %4900 = vmatmul.mubr.msk.f32.vlgmr.msra.gmra.mxu0 %vm579_vm3, %v1570_v10  ;;  %v2223_v61 = vrot.slane %v5562_v60, %v2222_v59 }
 0x815   : > { %4908 = vmatpush3.msra.mxu0 %v298_v11 }
 0x816   : > { %4917 = vmatprep.subr.mxu0 %v5252_v15 }
 0x8c9   : > { %v1720_v12 = vpop.f32.mrf.mxu1 }
 0x8cb   : > { %v4906_v13 = vpop.f32.mrf.mxu1 }
 0x8cd   : > { %v1881_v14 = vpop.f32.mrf.mxu1 }
 0x8ce   : > { %v1882_v23 = vadd.f32 %v1881_v14, %v5418_v22 }
 0x8cf   : > { %v4916_v24 = vpop.f32.mrf.mxu1 }
 0x8d0   : > { %v1963_v25 = vsel %vm579_vm3, %v1882_v23, -inf }
 0x8d1   : > { %1964 = vmax.xlane.f32.xlu0 %v1963_v25 }
 0x8d4   : > { %v1644_v27 = vpop.f32.mrf.mxu0 }
 0x8d5   : > { %4909 = vmatprep.mubr.msk.f32.mxu0 %vm579_vm3, %v1644_v27 }
 0x8d6   : > { %v4901_v28 = vpop.f32.mrf.mxu0  ;;  %4910 = vmatmul.mubr.msk.f32.vlgmr.msra.gmra.mxu0 %vm579_vm3, %v1720_v12 }
 0x8d7   : > { %4918 = vmatpush3.xpose.msk.msra.mxu0 %vm579_vm3, %v1888_v26  ;;  %4919 = vmatprep.mubr.msk.f32.mxu0 %vm5253_vm2, %v5252_v15 }
 0x8d8   : > { %4927 = vmatprep.subr.mxu0 %v5252_v15 }
 0x8da   : > { %4920 = vmatmul.mubr.msk.f32.vlgmr.msra.gmra.mxu0 %vm579_vm3, %v1886_v29  ;;  %v5586_v29 = vld [vmem:[%s5311_s28 + $0x38] sm:$0xff] }
 0x8db   : > { %4929 = vmatprep.mubr.msk.f32.mxu0 %vm5253_vm2, %v5252_v15 }
 0x95a   : > { %v1965_v30 = vpop.xlane.xlu0 %1964 }
 0x95b   : > { %v1969_v31 = vsub.f32 %v1882_v23, %v1965_v30  ;;  %v5589_v30 = vld [vmem:[%s5311_s28 + $0x28] sm:$0xff] }
 0x95d   : > { %v1971_v32 = vmul.f32 1.442695, %v1969_v31  ;;  %v5595_v31 = vld [vmem:[%s5891_s1] sm:$0xff] }
 0x95f   : > { %5149 = vpow2.f32 %v1971_v32 }
 0x96c   : > { %v5150_v33 = vpop.eup %5149 }
 0x96d   : > { %v1975_v34 = vsel %vm579_vm3, %v5150_v33, 0.0 }
 0x96e   : > { %1976 = vadd.xlane.f32.xlu0 %v1975_v34 }
 0x996   : > { %v4911_v36 = vpop.f32.mrf.mxu0 }
 0x997   : > { %v1806_v38 = vadd.f32 %v4911_v36, %v1391_v35 }
 0x998   : > { %v1796_v40 = vpop.f32.mrf.mxu0 }
 0x999   : > { %v1805_v42 = vadd.f32 %v1796_v40, %v1386_v37 }
 0x99a   : > { %v1959_v43 = vpop.f32.mrf.mxu0 }
 0x99b   : > { %v1960_v44 = vadd.f32 %v1959_v43, %v5418_v22 }
 0x99c   : > { %v4921_v45 = vpop.f32.mrf.mxu0 }
 0x99d   : > { %v1966_v46 = vsel %vm579_vm3, %v1960_v44, -inf }
 0x99e   : > { %1967 = vmax.xlane.f32.xlu1 %v1966_v46 }
 0x9af   : > { %1985 = vrot.lane.b32.xlu1 %v5410_v21, %s5256_s20  ;;  %v299_v21 = vld [vmem:[%s5316_s7 + $0x18] sm:$0xff] }
 0x9f7   : > { %v1977_v47 = vpop.xlane.xlu0 %1976 }
 0x9f8   : > { %5151 = vrcp.f32 %v1977_v47 }
 0xa05   : > { %v5152_v48 = vpop.eup %5151 }
 0xa06   : > { %v1983_v51 = vmul.f32 %v5152_v48, %v5150_v33 }
 0xa27   : > { %v1968_v39 = vpop.xlane.xlu1 %1967 }
 0xa28   : > { %v1970_v49 = vsub.f32 %v1960_v44, %v1968_v39 }
 0xa2a   : > { %v1973_v41 = vmul.f32 1.442695, %v1970_v49 }
 0xa2b   : > { %v1986_v50 = vpop.permute.xlu1 %1985 }
 0xa2c   : > { %5153 = vpow2.f32 %v1973_v41  ;;  %4923 = vmatpush3.msra.mxu1 %v1986_v50 }
 0xa2d   : > { %4925 = vmatmul.mubr.msk.f32.vlgmr.msra.gmra.mxu1 %vm579_vm3, %v1983_v51  ;;  %4932 = vmatprep.subr.mxu1 %v299_v21  ;;  %v2271_v51 = vsub.s32 1, %v5558_v58 }
 0xa2e   : > { %4933 = vmatpush3.msra.mxu1 %v299_v21 }
 0xa2f   : > { %4948 = vmatprep.subr.mxu1 %v5586_v29  ;;  %v2272_v21 = vrot.slane %v5562_v60, %v2271_v51 }
 0xa39   : > { %v5154_v22 = vpop.eup %5153 }
 0xa3a   : > { %v1978_v52 = vsel %vm579_vm3, %v5154_v22, 0.0 }
 0xa3b   : > { %1979 = vadd.xlane.f32.xlu0 %v1978_v52 }
 0xa51   : > { %2061 = vrot.lane.b32.xlu0 %v5405_v20, %s5256_s20 }
 0xac4   : > { %v1980_v53 = vpop.xlane.xlu0 %1979 }
 0xac5   : > { %5155 = vrcp.f32 %v1980_v53  ;;  %v2277_v53 = vsub.s32 2, %v5558_v58 }
 0xac8   : > { %v2062_v54 = vpop.permute.xlu0 %2061 }
 0xac9   : > { %4928 = vmatpush3.msra.mxu0 %v2062_v54 }
 0xad2   : > { %v5156_v18 = vpop.eup %5155 }
 0xad3   : > { %v1984_v55 = vmul.f32 %v5156_v18, %v5154_v22 }
 0xad5   : > { %4930 = vmatmul.mubr.msk.f32.vlgmr.msra.gmra.mxu0 %vm579_vm3, %v1984_v55 }
 0xaed   : > { %v2057_v16 = vpop.f32.mrf.mxu1 }
 0xaee   : > { %4934 = vmatprep.mubr.msk.f32.mxu1 %vm579_vm3, %v2057_v16  ;;  %v2278_v16 = vrot.slane %v5562_v60, %v2277_v53 }
 0xaef   : > { %v4926_v17 = vpop.f32.mrf.mxu1 }
 0xb95   : > { %v2133_v56 = vpop.f32.mrf.mxu0 }
 0xb96   : > { %4935 = vmatmul.mubr.msk.f32.vlgmr.msra.gmra.mxu1 %vm579_vm3, %v2133_v56 }
 0xb97   : > { %v4931_v20 = vpop.f32.mrf.mxu0  ;;  %4949 = vmatpush3.msra.mxu1 %v5586_v29  ;;  %4956 = vmatprep.mubr.msk.f32.mxu1 %vm319_vm1, %v5595_v31 }
 0xb98   : > { %4950 = vmatprep.subr.mxu1 %v5589_v30 }
 0xb99   : > { %4951 = vmatpush3.msra.mxu1 %v5589_v30 }
 0xc56   : > { %v4936_v62 = vpop.f32.mrf.mxu1 }
 0xc57   : > { %v2219_v63 = vadd.f32 %v4936_v62, %v1806_v38 }
 0xc58   : > { %v2209_v0 = vpop.f32.mrf.mxu1 }
 0xc59   : > { %v2225_v7 = vadd.f32 %v2223_v61, %v2219_v63  ;;  %v2218_v8 = vadd.f32 %v2209_v0, %v1805_v42 }
 0xc5b   : > { %v2224_v19 = vadd.f32 %v2223_v61, %v2218_v8  ;;  %v2227_v9 = vadd.f32 %v2225_v7, %v5359_v6 }
 0xc5d   : > { %v2231_v10 = vsel %vm319_vm1, %v2227_v9, 0.0  ;;  %v2226_v11 = vadd.f32 %v2224_v19, %v5337_v3 }
 0xc5e   : > { %2232 = vadd.xlane.f32.xlu0 %v2231_v10 }
 0xc5f   : > { %v2228_v12 = vsel %vm319_vm1, %v2226_v11, 0.0 }
 0xc60   : > { %2229 = vadd.xlane.f32.xlu1 %v2228_v12 }
 0xce7   : > { %v2233_v13 = vpop.xlane.xlu0 %2232 }
 0xce8   : > { %v2236_v14 = vmul.f32 0.03125, %v2233_v13 }
 0xce9   : > { %v2230_v23 = vpop.xlane.xlu1 %2229 }
 0xcea   : > { %v5571_v24 = vsub.f32 %v2227_v9, %v2236_v14  ;;  %v2235_v25 = vmul.f32 0.03125, %v2230_v23 }
 0xcec   : > { %v5573_v26 = vsub.f32 %v2226_v11, %v2235_v25  ;;  %v2240_v6 = vmul.f32 %v5571_v24, %v5571_v24 }
 0xcee   : > { %v2244_v27 = vsel %vm319_vm1, %v2240_v6, 0.0  ;;  %v2239_v3 = vmul.f32 %v5573_v26, %v5573_v26 }
 0xcef   : > { %2245 = vadd.xlane.f32.xlu0 %v2244_v27 }
 0xcf0   : > { %v2241_v28 = vsel %vm319_vm1, %v2239_v3, 0.0 }
 0xcf1   : > { %2242 = vadd.xlane.f32.xlu1 %v2241_v28 }
 0xd02   : > { %2287 = vrot.lane.b32.xlu1 %v5328_v1, %s5257_s23  ;;  %v5601_v1 = vld [vmem:[%s5311_s28 + $0x18] sm:$0xff] }
 0xd03   : > { %4952 = vmatprep.subr.mxu1 %v5601_v1 }
 0xd04   : > { %4953 = vmatpush3.msra.mxu1 %v5601_v1 }
 0xd05   : > { %2285 = vrot.lane.b32.xlu0 %v5340_v4, %s5257_s23  ;;  %v5619_v4 = vld [vmem:[%s5891_s1 + $0x8] sm:$0xff] }
 0xd06   : > { %2283 = vrot.lane.b32.xlu1 %v5331_v2, %s5257_s23  ;;  %v5610_v2 = vld [vmem:[%s5311_s28 + $0x8] sm:$0xff] }
 0xd07   : > { %4954 = vmatprep.subr.mxu1 %v5610_v2 }
 0xd08   : > { %4955 = vmatpush3.msra.mxu1 %v5610_v2 }
 0xd09   : > { %2465 = vrot.lane.b32.xlu0 %v5586_v29, %s5250_s14  ;;  %4957 = vmatmul.mubr.msk.f32.vlgmr.msra.gmra.mxu1 %vm319_vm1, %v5619_v4 }
 0xd0a   : > { %2281 = vrot.lane.b32.xlu1 %v5343_v5, %s5257_s23  ;;  %4970 = vmatprep.subr.mxu1 %v5252_v15 }
 0xd0b   : > { %4972 = vmatprep.mubr.msk.f32.mxu1 %vm5253_vm2, %v5252_v15 }
 0xd0d   : > { %2461 = vrot.lane.b32.xlu0 %v5601_v1, %s5250_s14 }
 0xd0e   : > { %2463 = vrot.lane.b32.xlu1 %v5589_v30, %s5250_s14 }
 0xd12   : > { %2459 = vrot.lane.b32.xlu1 %v5610_v2, %s5250_s14 }
 0xd78   : > { %v2246_v5 = vpop.xlane.xlu0 %2245 }
 0xd79   : > { %v2248_v32 = vmul.f32 0.032258064, %v2246_v5 }
 0xd7a   : > { %v2243_v33 = vpop.xlane.xlu1 %2242 }
 0xd7b   : > { %5157 = vrsqrt.f32 %v2248_v32  ;;  %v2247_v34 = vmul.f32 0.032258064, %v2243_v33  ;;  %vm2258_vm4 = vcmp.eq.f32.partialorder %v2248_v32, inf  ;;  %v2261_v43 = vand.u32 2147483648, %v2248_v32 }
 0xd7c   : > { %v2286_v36 = vpop.permute.xlu0 %2285  ;;  %vm2260_vm5 = vcmp.eq.f32.partialorder %v2248_v32, 0.0 }
 0xd7d   : > { %5159 = vrsqrt.f32 %v2247_v34  ;;  %vm2251_vm6 = vcmp.eq.f32.partialorder %v2247_v34, inf  ;;  %v2254_v48 = vand.u32 2147483648, %v2247_v34  ;;  %vm2253_vm7 = vcmp.eq.f32.partialorder %v2247_v34, 0.0 }
 0xd7e   : > { %v2288_v35 = vpop.permute.xlu1 %2287 }
 0xd7f   : > { %4937 = vmatprep.subr.mxu0 %v2288_v35 }
 0xd80   : > { %4938 = vmatpush3.msra.mxu0 %v2288_v35  ;;  %v2466_v0 = vpop.permute.xlu0 %2465 }
 0xd81   : > { %4939 = vmatprep.subr.mxu0 %v2286_v36 }
 0xd82   : > { %4940 = vmatpush3.msra.mxu0 %v2286_v36  ;;  %v2284_v37 = vpop.permute.xlu1 %2283 }
 0xd83   : > { %4941 = vmatprep.subr.mxu0 %v2284_v37 }
 0xd84   : > { %4942 = vmatpush3.msra.mxu0 %v2284_v37  ;;  %v2462_v8 = vpop.permute.xlu0 %2461 }
 0xd86   : > { %v2282_v38 = vpop.permute.xlu1 %2281 }
 0xd87   : > { %4943 = vmatprep.subr.mxu0 %v2282_v38 }
 0xd88   : > { %v5158_v40 = vpop.eup %5157  ;;  %4944 = vmatpush3.msra.mxu0 %v2282_v38 }
 0xd89   : > { %v2257_v42 = vmul.f32 %v5158_v40, %v2248_v32  ;;  %4959 = vmatprep.subr.mxu0 %v2466_v0 }
 0xd8a   : > { %v5160_v44 = vpop.eup %5159  ;;  %v2464_v7 = vpop.permute.xlu1 %2463 }
 0xd8b   : > { %v2259_v45 = vsel %vm2258_vm4, %v2248_v32, %v2257_v42  ;;  %v2250_v47 = vmul.f32 %v5160_v44, %v2247_v34 }
 0xd8c   : > { %v2262_v46 = vsel %vm2260_vm5, %v2261_v43, %v2259_v45 }
 0xd8d   : > { %v2264_v39 = vadd.f32 0.001, %v2262_v46  ;;  %v2252_v49 = vsel %vm2251_vm6, %v2247_v34, %v2250_v47 }
 0xd8e   : > { %v2255_v41 = vsel %vm2253_vm7, %v2254_v48, %v2252_v49  ;;  %v2460_v19 = vpop.permute.xlu1 %2459 }
 0xd8f   : > { %5161 = vrcp.f32 %v2264_v39  ;;  %v2263_v50 = vadd.f32 0.001, %v2255_v41 }
 0xd91   : > { %5163 = vrcp.f32 %v2263_v50 }
 0xd9c   : > { %v5162_v22 = vpop.eup %5161 }
 0xd9d   : > { %v2268_v52 = vmul.f32 %v5162_v22, %v5571_v24 }
 0xd9e   : > { %v5164_v54 = vpop.eup %5163 }
 0xd9f   : > { %v2266_v18 = vmul.f32 %v5164_v54, %v5573_v26  ;;  %v2274_v55 = vmul.f32 %v2272_v21, %v2268_v52 }
 0xda1   : > { %v2273_v17 = vmul.f32 %v2272_v21, %v2266_v18  ;;  %v5640_v20 = vadd.f32 %v2278_v16, %v2274_v55 }
 0xda3   : > { %v5638_v56 = vadd.f32 %v2278_v16, %v2273_v17 }
 0xda5   : > { %4945 = vmatprep.mubr.msk.f32.mxu0 %vm319_vm1, %v5638_v56 }
 0xda6   : > { %4946 = vmatmul.mubr.msk.f32.vlgmr.msra.gmra.mxu0 %vm319_vm1, %v5640_v20 }
 0xda7   : > { %4967 = vmatprep.mubr.msk.f32.mxu0 %vm319_vm1, %v5595_v31  ;;  %4960 = vmatpush3.msra.mxu0 %v2466_v0 }
 0xda8   : > { %4961 = vmatprep.subr.mxu0 %v2464_v7 }
 0xda9   : > { %4962 = vmatpush3.msra.mxu0 %v2464_v7 }
 0xdaa   : > { %4963 = vmatprep.subr.mxu0 %v2462_v8 }
 0xdab   : > { %4964 = vmatpush3.msra.mxu0 %v2462_v8 }
 0xdac   : > { %4965 = vmatprep.subr.mxu0 %v2460_v19 }
 0xdad   : > { %4966 = vmatpush3.msra.mxu0 %v2460_v19 }
 0xdae   : > { %4968 = vmatmul.mubr.msk.f32.vlgmr.msra.gmra.mxu0 %vm319_vm1, %v5619_v4  ;;  %4980 = vmatprep.subr.mxu0 %v5252_v15 }
 0xdaf   : > { %4982 = vmatprep.mubr.msk.f32.mxu0 %vm5253_vm2, %v5252_v15 }
 0xdc9   : > { %v5648_v57 = vpop.f32.mrf.mxu1 }
 0xdcb   : > { %v5650_v61 = vpop.f32.mrf.mxu1 }
 0xdcc   : > { %4971 = vmatpush3.xpose.msk.msra.mxu1 %vm579_vm3, %v5650_v61 }
 0xdcd   : > { %4975 = vmatprep.subr.mxu1 %v5252_v15 }
 0xe66   : > { %v5655_v62 = vpop.f32.mrf.mxu0 }
 0xe68   : > { %v5657_v63 = vpop.f32.mrf.mxu0 }
 0xe69   : > { %4973 = vmatmul.mubr.msk.f32.vlgmr.msra.gmra.mxu1 %vm579_vm3, %v5657_v63 }
 0xe6a   : > { %4976 = vmatpush3.xpose.msk.msra.mxu1 %vm579_vm3, %v5648_v57  ;;  %4977 = vmatprep.mubr.msk.f32.mxu1 %vm5253_vm2, %v5252_v15 }
 0xe6b   : > { %4985 = vmatprep.subr.mxu1 %v5252_v15 }
 0xe6d   : > { %4978 = vmatmul.mubr.msk.f32.vlgmr.msra.gmra.mxu1 %vm579_vm3, %v5655_v62 }
 0xe6e   : > { %4987 = vmatprep.mubr.msk.f32.mxu1 %vm5253_vm2, %v5252_v15  ;;  %v5685_v5 = vpop.f32.mrf.mxu0 }
 0xe6f   : > { %4986 = vmatpush3.msra.mxu1 %v5685_v5 }
 0xe70   : > { %v5688_v32 = vpop.f32.mrf.mxu0  ;;  %4995 = vmatprep.subr.mxu1 %v5252_v15 }
 0xe71   : > { %4981 = vmatpush3.msra.mxu0 %v5688_v32 }
 0xe72   : > { %4990 = vmatprep.subr.mxu0 %v5252_v15 }
 0xf29   : > { %v2618_v9 = vpop.f32.mrf.mxu1 }
 0xf2a   : > { %v2698_v10 = vsel %vm579_vm3, %v2618_v9, -inf }
 0xf2b   : > { %2699 = vmax.xlane.f32.xlu0 %v2698_v10  ;;  %v4974_v11 = vpop.f32.mrf.mxu1 }
 0xf2c   : > { %v300_v11 = vld [vmem:[%s5316_s7 + $0x20] sm:$0xff] }
 0xf2d   : > { %v2694_v12 = vpop.f32.mrf.mxu1 }
 0xf2e   : > { %v2701_v13 = vsel %vm579_vm3, %v2694_v12, -inf }
 0xf2f   : > { %2702 = vmax.xlane.f32.xlu1 %v2701_v13  ;;  %v4979_v14 = vpop.f32.mrf.mxu1 }
 0xf40   : > { %2868 = vrot.lane.b32.xlu1 %v5650_v61, %s5254_s18 }
 0xf44   : > { %2866 = vrot.lane.b32.xlu1 %v5657_v63, %s5254_s18 }
 0xf48   : > { %2944 = vrot.lane.b32.xlu1 %v5655_v62, %s5254_s18 }
 0xfb4   : > { %v2700_v23 = vpop.xlane.xlu0 %2699 }
 0xfb5   : > { %v2704_v24 = vsub.f32 %v2618_v9, %v2700_v23 }
 0xfb7   : > { %v2706_v25 = vmul.f32 1.442695, %v2704_v24 }
 0xfb8   : > { %v2703_v26 = vpop.xlane.xlu1 %2702 }
 0xfb9   : > { %5165 = vpow2.f32 %v2706_v25  ;;  %v2705_v6 = vsub.f32 %v2694_v12, %v2703_v26 }
 0xfbb   : > { %v2708_v27 = vmul.f32 1.442695, %v2705_v6 }
 0xfbc   : > { %v2869_v35 = vpop.permute.xlu1 %2868 }
 0xfbd   : > { %5167 = vpow2.f32 %v2708_v27  ;;  %v301_v27 = vld [vmem:[%s5316_s7 + $0x28] sm:$0xff] }
 0xfc0   : > { %v2867_v40 = vpop.permute.xlu1 %2866 }
 0xfc4   : > { %v2945_v44 = vpop.permute.xlu1 %2944 }
 0xfc6   : > { %v5166_v3 = vpop.eup %5165 }
 0xfc7   : > { %v2710_v28 = vsel %vm579_vm3, %v5166_v3, 0.0 }
 0xfc8   : > { %2711 = vadd.xlane.f32.xlu0 %v2710_v28 }
 0xfca   : > { %v5168_v31 = vpop.eup %5167 }
 0xfcb   : > { %v2713_v4 = vsel %vm579_vm3, %v5168_v31, 0.0 }
 0xfcc   : > { %2714 = vadd.xlane.f32.xlu0 %v2713_v4 }
 0xfe2   : > { %2946 = vrot.lane.b32.xlu0 %v5648_v57, %s5254_s18 }
0x1051   : > { %v2712_v33 = vpop.xlane.xlu0 %2711 }
0x1052   : > { %5169 = vrcp.f32 %v2712_v33 }
0x1055   : > { %v2715_v34 = vpop.xlane.xlu0 %2714 }
0x1056   : > { %5171 = vrcp.f32 %v2715_v34 }
0x1059   : > { %v2947_v43 = vpop.permute.xlu0 %2946 }
0x105f   : > { %v5170_v36 = vpop.eup %5169 }
0x1060   : > { %v2718_v37 = vmul.f32 %v5170_v36, %v5166_v3 }
0x1062   : > { %4983 = vmatmul.mubr.msk.f32.vlgmr.msra.gmra.mxu0 %vm579_vm3, %v2718_v37 }
0x1063   : > { %v5172_v38 = vpop.eup %5171  ;;  %4991 = vmatpush3.xpose.msk.msra.mxu0 %vm579_vm3, %v2869_v35  ;;  %4992 = vmatprep.mubr.msk.f32.mxu0 %vm5253_vm2, %v5252_v15 }
0x1064   : > { %v2719_v42 = vmul.f32 %v5172_v38, %v5168_v31  ;;  %5000 = vmatprep.subr.mxu0 %v5252_v15 }
0x1066   : > { %4988 = vmatmul.mubr.msk.f32.vlgmr.msra.gmra.mxu1 %vm579_vm3, %v2719_v42  ;;  %4993 = vmatmul.mubr.msk.f32.vlgmr.msra.gmra.mxu0 %vm579_vm3, %v2867_v40 }
0x1067   : > { %4996 = vmatpush3.xpose.msk.msra.mxu1 %vm579_vm3, %v2947_v43  ;;  %4997 = vmatprep.mubr.msk.f32.mxu1 %vm5253_vm2, %v5252_v15 }
0x1068   : > { %5005 = vmatprep.subr.mxu1 %v5252_v15  ;;  %5002 = vmatprep.mubr.msk.f32.mxu0 %vm5253_vm2, %v5252_v15 }
0x106a   : > { %4998 = vmatmul.mubr.msk.f32.vlgmr.msra.gmra.mxu1 %vm579_vm3, %v2945_v44 }
0x106b   : > { %5007 = vmatprep.mubr.msk.f32.mxu1 %vm5253_vm2, %v5252_v15 }
0x1122   : > { %v2789_v45 = vpop.f32.mrf.mxu0 }
0x1124   : > { %v4984_v46 = vpop.f32.mrf.mxu0 }
0x1126   : > { %v2862_v47 = vpop.f32.mrf.mxu1  ;;  %v2940_v39 = vpop.f32.mrf.mxu0 }
0x1127   : > { %v3022_v48 = vsel %vm579_vm3, %v2940_v39, -inf }
0x1128   : > { %v4989_v49 = vpop.f32.mrf.mxu1  ;;  %3023 = vmax.xlane.f32.xlu0 %v3022_v48  ;;  %v4994_v41 = vpop.f32.mrf.mxu0 }
0x112a   : > { %v3018_v50 = vpop.f32.mrf.mxu1 }
0x112b   : > { %v3025_v22 = vsel %vm579_vm3, %v3018_v50, -inf }
0x112c   : > { %3026 = vmax.xlane.f32.xlu1 %v3025_v22  ;;  %v4999_v52 = vpop.f32.mrf.mxu1 }
0x113d   : > { %3045 = vrot.lane.b32.xlu1 %v5688_v32, %s5254_s18 }
0x1141   : > { %3362 = vrot.lane.b32.xlu1 %v5650_v61, %s5255_s19 }
0x1145   : > { %3440 = vrot.lane.b32.xlu1 %v5648_v57, %s5255_s19 }
0x1149   : > { %3438 = vrot.lane.b32.xlu1 %v5655_v62, %s5255_s19 }
0x11b1   : > { %v3024_v21 = vpop.xlane.xlu0 %3023 }
0x11b2   : > { %v3028_v53 = vsub.f32 %v2940_v39, %v3024_v21 }
0x11b4   : > { %v3030_v54 = vmul.f32 1.442695, %v3028_v53 }
0x11b5   : > { %v3027_v18 = vpop.xlane.xlu1 %3026 }
0x11b6   : > { %5173 = vpow2.f32 %v3030_v54  ;;  %v3029_v55 = vsub.f32 %v3018_v50, %v3027_v18 }
0x11b8   : > { %v3032_v16 = vmul.f32 1.442695, %v3029_v55 }
0x11b9   : > { %v3046_v17 = vpop.permute.xlu1 %3045 }
0x11ba   : > { %5175 = vpow2.f32 %v3032_v16  ;;  %5001 = vmatpush3.msra.mxu0 %v3046_v17 }
0x11bb   : > { %5010 = vmatprep.subr.mxu0 %v301_v27 }
0x11bd   : > { %v3363_v23 = vpop.permute.xlu1 %3362 }
0x11c1   : > { %v3441_v26 = vpop.permute.xlu1 %3440 }
0x11c3   : > { %v5174_v0 = vpop.eup %5173 }
0x11c4   : > { %v3034_v7 = vsel %vm579_vm3, %v5174_v0, 0.0 }
0x11c5   : > { %3035 = vadd.xlane.f32.xlu0 %v3034_v7  ;;  %v3439_v6 = vpop.permute.xlu1 %3438 }
0x11c7   : > { %v5176_v8 = vpop.eup %5175 }
0x11c8   : > { %v3037_v19 = vsel %vm579_vm3, %v5176_v8, 0.0 }
0x11c9   : > { %3038 = vadd.xlane.f32.xlu0 %v3037_v19 }
0x11df   : > { %3122 = vrot.lane.b32.xlu0 %v5685_v5, %s5254_s18 }
0x11e3   : > { %3360 = vrot.lane.b32.xlu0 %v5657_v63, %s5255_s19 }
0x124e   : > { %v3036_v9 = vpop.xlane.xlu0 %3035 }
0x124f   : > { %5177 = vrcp.f32 %v3036_v9 }
0x1252   : > { %v3039_v10 = vpop.xlane.xlu0 %3038 }
0x1253   : > { %5179 = vrcp.f32 %v3039_v10 }
0x1256   : > { %v3123_v12 = vpop.permute.xlu0 %3122 }
0x1257   : > { %5006 = vmatpush3.msra.mxu1 %v3123_v12 }
0x1258   : > { %5015 = vmatprep.subr.mxu1 %v300_v11 }
0x125a   : > { %v3361_v33 = vpop.permute.xlu0 %3360 }
0x125c   : > { %v5178_v13 = vpop.eup %5177 }
0x125d   : > { %v3042_v14 = vmul.f32 %v5178_v13, %v5174_v0  ;;  %v302_v0 = vld [vmem:[%s5316_s7 + $0x30] sm:$0xff] }
0x125f   : > { %5003 = vmatmul.mubr.msk.f32.vlgmr.msra.gmra.mxu0 %vm579_vm3, %v3042_v14 }
0x1260   : > { %v5180_v24 = vpop.eup %5179  ;;  %5011 = vmatpush3.msra.mxu0 %v301_v27 }
0x1261   : > { %v3043_v25 = vmul.f32 %v5180_v24, %v5176_v8  ;;  %5020 = vmatprep.subr.mxu0 %v5252_v15 }
0x1263   : > { %5008 = vmatmul.mubr.msk.f32.vlgmr.msra.gmra.mxu1 %vm579_vm3, %v3043_v25 }
0x1264   : > { %5017 = vmatprep.mubr.msk.f32.mxu1 %vm579_vm3, %v2789_v45  ;;  %5016 = vmatpush3.msra.mxu1 %v300_v11 }
0x1265   : > { %5025 = vmatprep.subr.mxu1 %v5252_v15 }
0x1267   : > { %5018 = vmatmul.mubr.msk.f32.vlgmr.msra.gmra.mxu1 %vm579_vm3, %v2862_v47 }
0x1268   : > { %5026 = vmatpush3.xpose.msk.msra.mxu1 %vm579_vm3, %v3441_v26  ;;  %5027 = vmatprep.mubr.msk.f32.mxu1 %vm5253_vm2, %v5252_v15 }
0x1269   : > { %5035 = vmatprep.subr.mxu1 %v5252_v15 }
0x126b   : > { %5028 = vmatmul.mubr.msk.f32.vlgmr.msra.gmra.mxu1 %vm579_vm3, %v3439_v6 }
0x126c   : > { %5037 = vmatprep.mubr.msk.f32.mxu1 %vm5253_vm2, %v5252_v15 }
0x131f   : > { %v3117_v3 = vpop.f32.mrf.mxu0 }
0x1320   : > { %5012 = vmatprep.mubr.msk.f32.mxu0 %vm579_vm3, %v3117_v3 }
0x1321   : > { %v5004_v28 = vpop.f32.mrf.mxu0 }
0x1323   : > { %v3194_v31 = vpop.f32.mrf.mxu1 }
0x1324   : > { %5013 = vmatmul.mubr.msk.f32.vlgmr.msra.gmra.mxu0 %vm579_vm3, %v3194_v31 }
0x1325   : > { %5021 = vmatpush3.xpose.msk.msra.mxu0 %vm579_vm3, %v3363_v23  ;;  %v5009_v4 = vpop.f32.mrf.mxu1  ;;  %5022 = vmatprep.mubr.msk.f32.mxu0 %vm5253_vm2, %v5252_v15 }
0x1326   : > { %5030 = vmatprep.subr.mxu0 %v5252_v15 }
0x1327   : > { %v5748_v34 = vpop.f32.mrf.mxu1 }
0x1328   : > { %5023 = vmatmul.mubr.msk.f32.vlgmr.msra.gmra.mxu0 %vm579_vm3, %v3361_v33 }
0x1329   : > { %v5751_v35 = vpop.f32.mrf.mxu1  ;;  %5032 = vmatprep.mubr.msk.f32.mxu0 %vm5253_vm2, %v5252_v15 }
0x132b   : > { %v3512_v36 = vpop.f32.mrf.mxu1 }
0x132c   : > { %v3519_v37 = vsel %vm579_vm3, %v3512_v36, -inf }
0x132d   : > { %3520 = vmax.xlane.f32.xlu1 %v3519_v37  ;;  %v5029_v38 = vpop.f32.mrf.mxu1 }
0x133e   : > { %3538 = vrot.lane.b32.xlu1 %v5688_v32, %s5255_s19 }
0x1342   : > { %3775 = vrot.lane.b32.xlu1 %v5650_v61, %s5256_s20 }
0x1346   : > { %3853 = vrot.lane.b32.xlu1 %v5648_v57, %s5256_s20 }
0x134a   : > { %3851 = vrot.lane.b32.xlu1 %v5655_v62, %s5256_s20 }
0x13b6   : > { %v3521_v40 = vpop.xlane.xlu1 %3520 }
0x13b7   : > { %v3523_v43 = vsub.f32 %v3512_v36, %v3521_v40 }
0x13b9   : > { %v3526_v44 = vmul.f32 1.442695, %v3523_v43 }
0x13ba   : > { %v3539_v42 = vpop.permute.xlu1 %3538 }
0x13bb   : > { %5031 = vmatpush3.msra.mxu0 %v3539_v42  ;;  %5181 = vpow2.f32 %v3526_v44 }
0x13bc   : > { %5040 = vmatprep.subr.mxu0 %v302_v0 }
0x13be   : > { %v3776_v55 = vpop.permute.xlu1 %3775 }
0x13c2   : > { %v3854_v11 = vpop.permute.xlu1 %3853 }
0x13c6   : > { %v3852_v14 = vpop.permute.xlu1 %3851 }
0x13c8   : > { %v5182_v61 = vpop.eup %5181 }
0x13c9   : > { %v3531_v57 = vsel %vm579_vm3, %v5182_v61, 0.0 }
0x13e4   : > { %v5764_v45 = vpop.f32.mrf.mxu0 }
0x13e5   : > { %v3357_v27 = vadd.f32 %v5748_v34, %v5764_v45 }
0x13e6   : > { %v5766_v46 = vpop.f32.mrf.mxu0 }
0x13e7   : > { %v3352_v28 = vadd.f32 %v5751_v35, %v5766_v46 }
0x13e8   : > { %v3434_v47 = vpop.f32.mrf.mxu0 }
0x13e9   : > { %v3516_v39 = vsel %vm579_vm3, %v3434_v47, -inf }
0x13ea   : > { %3517 = vmax.xlane.f32.xlu0 %v3516_v39  ;;  %v5024_v48 = vpop.f32.mrf.mxu0 }
0x13ee   : > { %3532 = vadd.xlane.f32.xlu0 %v3531_v57 }
0x1473   : > { %v3518_v62 = vpop.xlane.xlu0 %3517 }
0x1474   : > { %v3522_v49 = vsub.f32 %v3434_v47, %v3518_v62 }
0x1476   : > { %v3524_v41 = vmul.f32 1.442695, %v3522_v49 }
0x1477   : > { %v3533_v52 = vpop.xlane.xlu0 %3532 }
0x1478   : > { %5183 = vpow2.f32 %v3524_v41 }
0x1479   : > { %5185 = vrcp.f32 %v3533_v52 }
0x1485   : > { %v5184_v50 = vpop.eup %5183 }
0x1486   : > { %v3528_v22 = vsel %vm579_vm3, %v5184_v50, 0.0  ;;  %v5186_v53 = vpop.eup %5185 }
0x1487   : > { %3529 = vadd.xlane.f32.xlu0 %v3528_v22  ;;  %v3537_v18 = vmul.f32 %v5186_v53, %v5182_v61 }
0x149d   : > { %3614 = vrot.lane.b32.xlu0 %v5685_v5, %s5255_s19 }
0x14a1   : > { %3773 = vrot.lane.b32.xlu0 %v5657_v63, %s5256_s20 }
0x1510   : > { %v3530_v21 = vpop.xlane.xlu0 %3529 }
0x1511   : > { %5187 = vrcp.f32 %v3530_v21 }
0x1514   : > { %v3615_v54 = vpop.permute.xlu0 %3614 }
0x1515   : > { %5036 = vmatpush3.msra.mxu1 %v3615_v54 }
0x1516   : > { %5038 = vmatmul.mubr.msk.f32.vlgmr.msra.gmra.mxu1 %vm579_vm3, %v3537_v18  ;;  %5045 = vmatprep.subr.mxu1 %v5252_v15 }
0x1517   : > { %5046 = vmatpush3.xpose.msk.msra.mxu1 %vm579_vm3, %v3776_v55  ;;  %5047 = vmatprep.mubr.msk.f32.mxu1 %vm5253_vm2, %v5252_v15 }
0x1518   : > { %v3774_v63 = vpop.permute.xlu0 %3773  ;;  %5055 = vmatprep.subr.mxu1 %v5252_v15 }
0x151a   : > { %5048 = vmatmul.mubr.msk.f32.vlgmr.msra.gmra.mxu1 %vm579_vm3, %v3774_v63 }
0x151b   : > { %5057 = vmatprep.mubr.msk.f32.mxu1 %vm5253_vm2, %v5252_v15 }
0x151e   : > { %v5188_v16 = vpop.eup %5187 }
0x151f   : > { %v3536_v17 = vmul.f32 %v5188_v16, %v5184_v50 }
0x1521   : > { %5033 = vmatmul.mubr.msk.f32.vlgmr.msra.gmra.mxu0 %vm579_vm3, %v3536_v17 }
0x1522   : > { %5041 = vmatpush3.msra.mxu0 %v302_v0 }
0x1523   : > { %5050 = vmatprep.subr.mxu0 %v5252_v15 }
0x15d6   : > { %v3686_v7 = vpop.f32.mrf.mxu1 }
0x15d8   : > { %v5039_v8 = vpop.f32.mrf.mxu1 }
0x15da   : > { %v3847_v19 = vpop.f32.mrf.mxu1 }
0x15db   : > { %v3929_v9 = vsel %vm579_vm3, %v3847_v19, -inf }
0x15dc   : > { %3930 = vmax.xlane.f32.xlu0 %v3929_v9  ;;  %v5049_v10 = vpop.f32.mrf.mxu1 }
0x15e1   : > { %v3610_v12 = vpop.f32.mrf.mxu0 }
0x15e2   : > { %5042 = vmatprep.mubr.msk.f32.mxu0 %vm579_vm3, %v3610_v12 }
0x15e3   : > { %v5034_v13 = vpop.f32.mrf.mxu0  ;;  %5043 = vmatmul.mubr.msk.f32.vlgmr.msra.gmra.mxu0 %vm579_vm3, %v3686_v7 }
0x15e4   : > { %5051 = vmatpush3.xpose.msk.msra.mxu0 %vm579_vm3, %v3854_v11  ;;  %5052 = vmatprep.mubr.msk.f32.mxu0 %vm5253_vm2, %v5252_v15  ;;  %v311_v13 = vld [vmem:[%s5316_s7 + $0x78] sm:$0xff] }
0x15e5   : > { %5060 = vmatprep.subr.mxu0 %v5252_v15 }
0x15e7   : > { %5053 = vmatmul.mubr.msk.f32.vlgmr.msra.gmra.mxu0 %vm579_vm3, %v3852_v14  ;;  %v310_v14 = vld [vmem:[%s5316_s7 + $0x70] sm:$0xff] }
0x15e8   : > { %5062 = vmatprep.mubr.msk.f32.mxu0 %vm5253_vm2, %v5252_v15 }
0x1665   : > { %v3931_v23 = vpop.xlane.xlu0 %3930 }
0x1666   : > { %v3935_v24 = vsub.f32 %v3847_v19, %v3931_v23  ;;  %v309_v23 = vld [vmem:[%s5316_s7 + $0x68] sm:$0xff] }
0x1668   : > { %v3937_v25 = vmul.f32 1.442695, %v3935_v24  ;;  %v308_v24 = vld [vmem:[%s5316_s7 + $0x60] sm:$0xff] }
0x166a   : > { %5189 = vpow2.f32 %v3937_v25 }
0x1677   : > { %v5190_v26 = vpop.eup %5189 }
0x1678   : > { %v3941_v6 = vsel %vm579_vm3, %v5190_v26, 0.0 }
0x1679   : > { %3942 = vadd.xlane.f32.xlu0 %v3941_v6 }
0x16a3   : > { %v5044_v3 = vpop.f32.mrf.mxu0 }
0x16a4   : > { %v3772_v31 = vadd.f32 %v5044_v3, %v3357_v27 }
0x16a5   : > { %v3762_v4 = vpop.f32.mrf.mxu0 }
0x16a6   : > { %v3771_v33 = vadd.f32 %v3762_v4, %v3352_v28 }
0x16a7   : > { %v3925_v36 = vpop.f32.mrf.mxu0 }
0x16a8   : > { %v3932_v15 = vsel %vm579_vm3, %v3925_v36, -inf }
0x16a9   : > { %3933 = vmax.xlane.f32.xlu1 %v3932_v15  ;;  %v5054_v37 = vpop.f32.mrf.mxu0 }
0x16ba   : > { %3951 = vrot.lane.b32.xlu1 %v5688_v32, %s5256_s20  ;;  %v303_v32 = vld [vmem:[%s5316_s7 + $0x38] sm:$0xff] }
0x1702   : > { %v3943_v38 = vpop.xlane.xlu0 %3942 }
0x1703   : > { %5191 = vrcp.f32 %v3943_v38 }
0x1710   : > { %v5192_v34 = vpop.eup %5191 }
0x1711   : > { %v3949_v35 = vmul.f32 %v5192_v34, %v5190_v26 }
0x1732   : > { %v3934_v40 = vpop.xlane.xlu1 %3933 }
0x1733   : > { %v3936_v42 = vsub.f32 %v3925_v36, %v3934_v40 }
0x1735   : > { %v3939_v43 = vmul.f32 1.442695, %v3936_v42 }
0x1736   : > { %v3952_v44 = vpop.permute.xlu1 %3951 }
0x1737   : > { %5193 = vpow2.f32 %v3939_v43  ;;  %5056 = vmatpush3.msra.mxu1 %v3952_v44  ;;  %v4236_v43 = vsub.s32 4, %v5558_v58 }
0x1738   : > { %5058 = vmatmul.mubr.msk.f32.vlgmr.msra.gmra.mxu1 %vm579_vm3, %v3949_v35  ;;  %5065 = vmatprep.subr.mxu1 %v303_v32 }
0x1739   : > { %5066 = vmatpush3.msra.mxu1 %v303_v32 }
0x173a   : > { %5081 = vmatprep.subr.mxu1 %v311_v13 }
0x1744   : > { %v5194_v45 = vpop.eup %5193 }
0x1745   : > { %v3944_v46 = vsel %vm579_vm3, %v5194_v45, 0.0 }
0x1746   : > { %3945 = vadd.xlane.f32.xlu0 %v3944_v46  ;;  %v4242_v46 = vsub.s32 5, %v5558_v58 }
0x175c   : > { %4027 = vrot.lane.b32.xlu0 %v5685_v5, %s5256_s20  ;;  %v4188_v5 = vsub.s32 3, %v5558_v58 }
0x175e   : > { %v4189_v50 = vrot.slane %v5562_v60, %v4188_v5  ;;  %v305_v5 = vld [vmem:[%s5316_s7 + $0x48] sm:$0xff] }
0x17cf   : > { %v3946_v47 = vpop.xlane.xlu0 %3945 }
0x17d0   : > { %5195 = vrcp.f32 %v3946_v47 }
0x17d3   : > { %v4028_v39 = vpop.permute.xlu0 %4027 }
0x17d4   : > { %5061 = vmatpush3.msra.mxu0 %v4028_v39 }
0x17dd   : > { %v5196_v61 = vpop.eup %5195 }
0x17de   : > { %v3950_v48 = vmul.f32 %v5196_v61, %v5194_v45  ;;  %v4237_v45 = vrot.slane %v5562_v60, %v4236_v43  ;;  %v4243_v61 = vrot.slane %v5562_v60, %v4242_v46 }
0x17e0   : > { %5063 = vmatmul.mubr.msk.f32.vlgmr.msra.gmra.mxu0 %vm579_vm3, %v3950_v48 }
0x17f8   : > { %v4023_v57 = vpop.f32.mrf.mxu1 }
0x17f9   : > { %5067 = vmatprep.mubr.msk.f32.mxu1 %vm579_vm3, %v4023_v57 }
0x17fa   : > { %v5059_v62 = vpop.f32.mrf.mxu1 }
0x18a0   : > { %v4099_v49 = vpop.f32.mrf.mxu0 }
0x18a1   : > { %5068 = vmatmul.mubr.msk.f32.vlgmr.msra.gmra.mxu1 %vm579_vm3, %v4099_v49  ;;  %v307_v49 = vld [vmem:[%s5316_s7 + $0x58] sm:$0xff] }
0x18a2   : > { %v5064_v41 = vpop.f32.mrf.mxu0  ;;  %5082 = vmatpush3.msra.mxu1 %v311_v13 }
0x18a3   : > { %5083 = vmatprep.subr.mxu1 %v310_v14  ;;  %v306_v41 = vld [vmem:[%s5316_s7 + $0x50] sm:$0xff] }
0x18a4   : > { %5084 = vmatpush3.msra.mxu1 %v310_v14 }
0x18a5   : > { %5085 = vmatprep.subr.mxu1 %v309_v23 }
0x18a6   : > { %5086 = vmatpush3.msra.mxu1 %v309_v23 }
0x18a7   : > { %5087 = vmatprep.subr.mxu1 %v308_v24 }
0x18a8   : > { %5088 = vmatpush3.msra.mxu1 %v308_v24 }
0x18a9   : > { %5089 = vmatprep.subr.mxu1 %v307_v49 }
0x18aa   : > { %5090 = vmatpush3.msra.mxu1 %v307_v49 }
0x18ab   : > { %5091 = vmatprep.subr.mxu1 %v306_v41 }
0x18ac   : > { %5092 = vmatpush3.msra.mxu1 %v306_v41 }
0x18ad   : > { %5093 = vmatprep.subr.mxu1 %v305_v5 }
0x18ae   : > { %5094 = vmatpush3.msra.mxu1 %v305_v5 }
0x1961   : > { %v5069_v22 = vpop.f32.mrf.mxu1 }
0x1962   : > { %v4185_v52 = vadd.f32 %v5069_v22, %v3772_v31  ;;  %v5854_v22 = vld [vmem:[%s5321_s11 + $0x8] sm:$0x3] }
0x1963   : > { %v4175_v21 = vpop.f32.mrf.mxu1 }
0x1964   : > { %v4191_v53 = vadd.f32 %v4189_v50, %v4185_v52  ;;  %v4184_v54 = vadd.f32 %v4175_v21, %v3771_v33  ;;  %v4249_v52 = vrot.slane %v5854_v22, %v2271_v51 }
0x1966   : > { %v4190_v18 = vadd.f32 %v4189_v50, %v4184_v54  ;;  %v4193_v55 = vadd.f32 %v4191_v53, %v5640_v20  ;;  %v304_v50 = vld [vmem:[%s5316_s7 + $0x40] sm:$0xff] }
0x1967   : > { %5095 = vmatprep.subr.mxu1 %v304_v50 }
0x1968   : > { %v4197_v63 = vsel %vm319_vm1, %v4193_v55, 0.0  ;;  %v4192_v16 = vadd.f32 %v4190_v18, %v5638_v56  ;;  %5096 = vmatpush3.msra.mxu1 %v304_v50 }
0x1969   : > { %4198 = vadd.xlane.f32.xlu0 %v4197_v63 }
0x196a   : > { %v4194_v17 = vsel %vm319_vm1, %v4192_v16, 0.0 }
0x196b   : > { %4195 = vadd.xlane.f32.xlu1 %v4194_v17 }
0x19f2   : > { %v4199_v0 = vpop.xlane.xlu0 %4198 }
0x19f3   : > { %v4201_v7 = vmul.f32 0.03125, %v4199_v0 }
0x19f4   : > { %v4196_v8 = vpop.xlane.xlu1 %4195 }
0x19f5   : > { %v5819_v19 = vsub.f32 %v4193_v55, %v4201_v7  ;;  %v4200_v9 = vmul.f32 0.03125, %v4196_v8 }
0x19f7   : > { %v5821_v10 = vsub.f32 %v4192_v16, %v4200_v9  ;;  %v4205_v20 = vmul.f32 %v5819_v19, %v5819_v19  ;;  %v4347_v16 = vsub.s32 6, %v5558_v58 }
0x19f9   : > { %v4209_v56 = vsel %vm319_vm1, %v4205_v20, 0.0  ;;  %v4204_v11 = vmul.f32 %v5821_v10, %v5821_v10  ;;  %v4348_v17 = vrot.slane %v5562_v60, %v4347_v16 }
0x19fa   : > { %4210 = vadd.xlane.f32.xlu0 %v4209_v56 }
0x19fb   : > { %v4206_v12 = vsel %vm319_vm1, %v4204_v11, 0.0 }
0x19fc   : > { %4207 = vadd.xlane.f32.xlu1 %v4206_v12 }
0x1a0d   : > { %4256 = vrot.lane.b32.xlu1 %v5586_v29, %s5251_s15 }
0x1a10   : > { %4254 = vrot.lane.b32.xlu0 %v5589_v30, %s5251_s15 }
0x1a11   : > { %4252 = vrot.lane.b32.xlu1 %v5601_v1, %s5251_s15 }
0x1a15   : > { %4250 = vrot.lane.b32.xlu1 %v5610_v2, %s5251_s15 }
0x1a83   : > { %v4211_v29 = vpop.xlane.xlu0 %4210 }
0x1a84   : > { %v4213_v30 = vmul.f32 0.032258064, %v4211_v29 }
0x1a85   : > { %v4208_v25 = vpop.xlane.xlu1 %4207 }
0x1a86   : > { %5197 = vrsqrt.f32 %v4213_v30  ;;  %v4212_v1 = vmul.f32 0.032258064, %v4208_v25  ;;  %vm4223_vm8 = vcmp.eq.f32.partialorder %v4213_v30, inf  ;;  %v4226_v31 = vand.u32 2147483648, %v4213_v30 }
0x1a87   : > { %v4255_v2 = vpop.permute.xlu0 %4254  ;;  %vm4225_vm9 = vcmp.eq.f32.partialorder %v4213_v30, 0.0 }
0x1a88   : > { %5199 = vrsqrt.f32 %v4212_v1  ;;  %vm4216_vm10 = vcmp.eq.f32.partialorder %v4212_v1, inf  ;;  %v4219_v38 = vand.u32 2147483648, %v4212_v1  ;;  %vm4218_vm11 = vcmp.eq.f32.partialorder %v4212_v1, 0.0 }
0x1a89   : > { %v4257_v26 = vpop.permute.xlu1 %4256 }
0x1a8a   : > { %5070 = vmatprep.subr.mxu0 %v4257_v26 }
0x1a8b   : > { %5071 = vmatpush3.msra.mxu0 %v4257_v26 }
0x1a8c   : > { %5072 = vmatprep.subr.mxu0 %v4255_v2 }
0x1a8d   : > { %5073 = vmatpush3.msra.mxu0 %v4255_v2  ;;  %v4253_v6 = vpop.permute.xlu1 %4252 }
0x1a8e   : > { %5074 = vmatprep.subr.mxu0 %v4253_v6 }
0x1a8f   : > { %5075 = vmatpush3.msra.mxu0 %v4253_v6 }
0x1a91   : > { %v4251_v27 = vpop.permute.xlu1 %4250 }
0x1a92   : > { %5076 = vmatprep.subr.mxu0 %v4251_v27 }
0x1a93   : > { %v5198_v3 = vpop.eup %5197  ;;  %5077 = vmatpush3.msra.mxu0 %v4251_v27 }
0x1a94   : > { %v4222_v28 = vmul.f32 %v5198_v3, %v4213_v30 }
0x1a95   : > { %v5200_v4 = vpop.eup %5199 }
0x1a96   : > { %v4224_v33 = vsel %vm4223_vm8, %v4213_v30, %v4222_v28  ;;  %v4215_v15 = vmul.f32 %v5200_v4, %v4212_v1 }
0x1a97   : > { %v4227_v36 = vsel %vm4225_vm9, %v4226_v31, %v4224_v33 }
0x1a98   : > { %v4229_v37 = vadd.f32 0.001, %v4227_v36  ;;  %v4217_v40 = vsel %vm4216_vm10, %v4212_v1, %v4215_v15 }
0x1a99   : > { %v4220_v34 = vsel %vm4218_vm11, %v4219_v38, %v4217_v40 }
0x1a9a   : > { %5201 = vrcp.f32 %v4229_v37  ;;  %v4228_v42 = vadd.f32 0.001, %v4220_v34  ;;  %v4475_v34 = vsub.s32 7, %v5558_v58 }
0x1a9c   : > { %5203 = vrcp.f32 %v4228_v42  ;;  %v5213_v42 = vld [vmem:[%s5321_s11] sm:$0xff] }
0x1a9d   : > { %v4476_v43 = vrot.slane %v5213_v42, %v4475_v34 }
0x1aa7   : > { %v5202_v44 = vpop.eup %5201 }
0x1aa8   : > { %v4233_v35 = vmul.f32 %v5202_v44, %v5819_v19 }
0x1aa9   : > { %v5204_v32 = vpop.eup %5203 }
0x1aaa   : > { %v4231_v47 = vmul.f32 %v5204_v32, %v5821_v10  ;;  %v4239_v39 = vmul.f32 %v4237_v45, %v4233_v35  ;;  %v4482_v35 = vrot.slane %v5854_v22, %v2222_v59 }
0x1aac   : > { %v4238_v48 = vmul.f32 %v4237_v45, %v4231_v47  ;;  %v4245_v62 = vadd.f32 %v4243_v61, %v4239_v39 }
0x1aae   : > { %v4244_v57 = vadd.f32 %v4243_v61, %v4238_v48 }
0x1ab0   : > { %5078 = vmatprep.mubr.msk.f32.mxu0 %vm319_vm1, %v4244_v57 }
0x1ab1   : > { %5079 = vmatmul.mubr.msk.f32.vlgmr.msra.gmra.mxu0 %vm319_vm1, %v4245_v62 }
0x1b71   : > { %v5080_v21 = vpop.f32.mrf.mxu0 }
0x1b72   : > { %v4340_v53 = vadd.f32 %v5080_v21, %v4249_v52 }
0x1b73   : > { %v4334_v54 = vpop.f32.mrf.mxu0 }
0x1b74   : > { %v4335_v18 = vadd.f32 %v4334_v54, %v4249_v52  ;;  %v4344_v63 = vmax.f32 %v4340_v53, 0.0 }
0x1b76   : > { %v4343_v55 = vmax.f32 %v4335_v18, 0.0 }
0x1b78   : > { %5097 = vmatprep.mubr.msk.f32.mxu1 %vm4349_vm12, %v4343_v55 }
0x1b79   : > { %5098 = vmatmul.mubr.msk.f32.vlgmr.msra.gmra.mxu1 %vm4349_vm12, %v4344_v63 }
0x1c39   : > { %v5099_v0 = vpop.f32.mrf.mxu1 }
0x1c3a   : > { %v4428_v7 = vadd.f32 %v5099_v0, %v4348_v17 }
0x1c3b   : > { %v4422_v8 = vpop.f32.mrf.mxu1 }
0x1c3c   : > { %v4423_v19 = vadd.f32 %v4422_v8, %v4348_v17  ;;  %v4432_v9 = vadd.f32 %v4428_v7, %v4245_v62 }
0x1c3e   : > { %v4436_v51 = vsel %vm319_vm1, %v4432_v9, 0.0  ;;  %v4431_v10 = vadd.f32 %v4423_v19, %v4244_v57 }
0x1c3f   : > { %4437 = vadd.xlane.f32.xlu1 %v4436_v51 }
0x1c40   : > { %v4433_v20 = vsel %vm319_vm1, %v4431_v10, 0.0 }
0x1c41   : > { %4434 = vadd.xlane.f32.xlu0 %v4433_v20 }
0x1cc8   : > { %v4438_v56 = vpop.xlane.xlu1 %4437 }
0x1cc9   : > { %v4440_v11 = vmul.f32 0.03125, %v4438_v56 }
0x1cca   : > { %v4435_v12 = vpop.xlane.xlu0 %4434 }
0x1ccb   : > { %v4439_v13 = vmul.f32 0.03125, %v4435_v12  ;;  %v4442_v14 = vsub.f32 %v4432_v9, %v4440_v11 }
0x1ccd   : > { %v4441_v23 = vsub.f32 %v4431_v10, %v4439_v13  ;;  %v4444_v29 = vmul.f32 %v4442_v14, %v4442_v14 }
0x1ccf   : > { %v4443_v24 = vmul.f32 %v4441_v23, %v4441_v23  ;;  %v4448_v30 = vsel %vm319_vm1, %v4444_v29, 0.0 }
0x1cd1   : > { %v4445_v60 = vsel %vm319_vm1, %v4443_v24, 0.0 }
0x1cd2   : > { %4446 = vadd.xlane.f32.xlu0 %v4445_v60 }
0x1cd6   : > { %4449 = vadd.xlane.f32.xlu0 %v4448_v30 }
0x1d5b   : > { %v4447_v25 = vpop.xlane.xlu0 %4446 }
0x1d5c   : > { %v4451_v1 = vmul.f32 0.032258064, %v4447_v25 }
0x1d5e   : > { %5205 = vrsqrt.f32 %v4451_v1  ;;  %vm4455_vm13 = vcmp.eq.f32.partialorder %v4451_v1, inf  ;;  %v4458_v3 = vand.u32 2147483648, %v4451_v1  ;;  %vm4457_vm14 = vcmp.eq.f32.partialorder %v4451_v1, 0.0 }
0x1d5f   : > { %v4450_v26 = vpop.xlane.xlu0 %4449 }
0x1d60   : > { %v4452_v2 = vmul.f32 0.032258064, %v4450_v26 }
0x1d62   : > { %5207 = vrsqrt.f32 %v4452_v2  ;;  %vm4462_vm15 = vcmp.eq.f32.partialorder %v4452_v2, inf  ;;  %v4465_v15 = vand.u32 2147483648, %v4452_v2  ;;  %vm4464_vm0 = vcmp.eq.f32.partialorder %v4452_v2, 0.0 }
0x1d6b   : > { %v5206_v6 = vpop.eup %5205 }
0x1d6c   : > { %v4454_v27 = vmul.f32 %v5206_v6, %v4451_v1 }
0x1d6e   : > { %v4456_v28 = vsel %vm4455_vm13, %v4451_v1, %v4454_v27 }
0x1d6f   : > { %v5208_v31 = vpop.eup %5207  ;;  %v4459_v4 = vsel %vm4457_vm14, %v4458_v3, %v4456_v28 }
0x1d70   : > { %v4467_v33 = vadd.f32 0.001, %v4459_v4  ;;  %v4461_v36 = vmul.f32 %v5208_v31, %v4452_v2 }
0x1d72   : > { %5209 = vrcp.f32 %v4467_v33  ;;  %v4463_v37 = vsel %vm4462_vm15, %v4452_v2, %v4461_v36 }
0x1d73   : > { %v4466_v38 = vsel %vm4464_vm0, %v4465_v15, %v4463_v37 }
0x1d74   : > { %v4468_v40 = vadd.f32 0.001, %v4466_v38 }
0x1d76   : > { %5211 = vrcp.f32 %v4468_v40 }
0x1d7f   : > { %v5210_v44 = vpop.eup %5209 }
0x1d80   : > { %v4470_v45 = vmul.f32 %v5210_v44, %v4441_v23 }
0x1d82   : > { %v4477_v46 = vmul.f32 %v4476_v43, %v4470_v45 }
0x1d83   : > { %v5212_v32 = vpop.eup %5211 }
0x1d84   : > { %v4483_v47 = vadd.f32 %v4482_v35, %v4477_v46  ;;  %v4472_v39 = vmul.f32 %v5212_v32, %v4442_v14 }
0x1d86   : > { %4485 = vst.msk [vmem:[#allocation2] sm:$0xff] %vm319_vm1, %v4483_v47  ;;  %v4478_v61 = vmul.f32 %v4476_v43, %v4472_v39  ;;  %4490 = sbr.rel (%p4656_p5) target bundleno = 7564 (0x1d8c), region = 52 }
0x1d88   : > { %v4484_v48 = vadd.f32 %v4482_v35, %v4478_v61 }
0x1d8a   : > { %4486 = vst.msk [vmem:[#allocation2 + $0x8] sm:$0xff] %vm319_vm1, %v4484_v48 }
0x1d8b   : > { %4491 = vst.msk [vmem:[#allocation3] sm:$0xff] %vm319_vm1, %v4483_v47  ;;  %4492 = vst.msk [vmem:[#allocation3 + $0x8] sm:$0xff] %vm319_vm1, %v4484_v48 }
0x1d8c PF: > { %p5104_p6 = scmp.eq.s32.totalorder %s5302_s22, 1  ;;  %s5258_s28 = smov [#allocation3]  }
0x1d8d   : > { %s4499_s29 = sshll.u32 %s5258_s28, 4  ;;  %s4500_s29 = int_to_ptr.vmem [resolvable:$true] %s4499_s29 }
0x1d8e   : > { %s5214_s30 = scalar_lea.vmem %s4500_s29, 256  ;;  %p5221_p10 = scmp.lt.s32.totalorder %s4500_s29, %s4500_s29 }
0x1d8f   : > { %p5215_p7 = scmp.ne.s32.totalorder %s4500_s29, %s5214_s30  ;;  %p5222_p11 = scmp.lt.s32.totalorder %s5214_s30, %s5214_s30 }
0x1d91   : > { %p5216_p8 = pnand %p5215_p7, %p5104_p6  ;;  %p5223_p12 = por %p5222_p11, %p5221_p10 }
0x1d93   : > { %p5217_p9 = pneg %p5216_p8 }
0x1d95   : > { %p5224_p13 = pnand %p5223_p12, %p5217_p9 }
0x1d97   : > { %5227 = shalt.err (!%p5224_p13)
}
0x1d98   : > { %s5259_s7 = smov 128   ;;  %s5260_s8 = smov 8  }
0x1d99   : > { %5101 = dma.vmem_to_hbm [thread:$0]  (%p5104_p6), %s4500_s29, 256, %s5896_s6, [#allocation4], %s5259_s7, %s5259_s7, %s5260_s8  }
0x1d9a   : > { %5243 = dma.done.wait (%p5104_p6), [#allocation4], 256  }
0x1d9b   : > { %5245 = vsyncadd (%p5104_p6), [#allocation4], 4294967040 }
0x1d9c PF: > { %s17_s21 = sadd.s32 1, %s5248_s21  }
0x1d9d   : > { %p14_p0 = scmp.ge.s32.totalorder %s17_s21, 4  }
0x1d9f   :  { %16 = sbr.rel (!%p14_p0) target bundleno = 1 (0x1), region = 86 }
0x1da4   :  { %4515 = vsyncpa [#allocation4], 1 }
0x1da5   :  { %4517 = vsyncpa [#allocation4 + $0x1], 1 }

</bundles_post_ra>
